<compile_context>
chip_gen: v7x
topology: tpu7x:2x2x1
jax: 0.10.0
libtpu: 0.0.40
codegen_flags: <defaults>
</compile_context>

<pallas_src>
import jax
import jax.numpy as jnp
from jax.experimental import pallas as pl
from jax.experimental.pallas import tpu as pltpu

# ---------------- config ----------------
VOCAB = 100
HIDDEN = 32
N_HEADS = 4
HEAD_DIM = HIDDEN // N_HEADS
INTERMEDIATE = 64
N_LAYERS = 2
MAX_POS = 64
N_CLASSES = 3
LN_EPS = 1e-12
LANE = 128

# ---- packed-slab row layout ----
# Matrix slab: per layer [wqkv(32) | wo(32) | w1(32) | w2(64)], then pool_w, out_w.
W_ROWS_PER_LAYER = 3 * HIDDEN + INTERMEDIATE                  # 160
W_POOL_ROW = N_LAYERS * W_ROWS_PER_LAYER                      # 320
W_OUT_ROW = W_POOL_ROW + HIDDEN                               # 352
W_TOTAL_ROWS = W_OUT_ROW + HIDDEN                             # 384
# Bias slab: [emb_ln_g, emb_ln_b] + per layer
#   [bqkv, bo, ln1_g, ln1_b, b1, b2, ln2_g, ln2_b] + [pool_b, out_b].
B_ROWS_PER_LAYER = 8
B_POOL_ROW = 2 + N_LAYERS * B_ROWS_PER_LAYER                  # 18
B_OUT_ROW = B_POOL_ROW + 1                                    # 19
B_TOTAL_ROWS = 24                                             # padded to 8-multiple


# ---------------- fused Pallas kernel (one grid step == one batch row) ----------------
def _fused_forward_kernel(emb_ref, mask_ref, w_ref, b_ref, out_ref, ctx_ref):
    f32 = jnp.float32

    def layer_norm(v, g, b):
        mean = jnp.mean(v, axis=-1, keepdims=True)
        var = jnp.mean((v - mean) ** 2, axis=-1, keepdims=True)
        return (v - mean) * jax.lax.rsqrt(var + LN_EPS) * g + b

    def gelu(v):
        # TODO(synk): HF BERT default is the exact erf GELU; tanh approximation used here.
        return 0.5 * v * (1.0 + jnp.tanh(0.7978845608028654 * (v + 0.044715 * v * v * v)))

    def wmat(r0, rows, cols):
        return w_ref[r0:r0 + rows, 0:cols]          # static slice of packed matrix slab

    def bvec(r, cols):
        return b_ref[r:r + 1, 0:cols]                # static slice of packed bias slab

    x = emb_ref[...].astype(f32)                     # (S, H) summed word+pos+type embeddings
    mask = mask_ref[...].astype(f32)                 # (1, S) additive attention mask (0 / -10000)

    x = layer_norm(x, bvec(0, HIDDEN), bvec(1, HIDDEN))   # embedding LayerNorm
    # embedding dropout: identity in eval mode

    scale = 1.0 / (HEAD_DIM ** 0.5)
    contract_last = (((1,), (1,)), ((), ()))         # q · kᵀ without materializing a transpose

    for l in range(N_LAYERS):
        wr = l * W_ROWS_PER_LAYER
        br = 2 + l * B_ROWS_PER_LAYER
        wqkv = wmat(wr, HIDDEN, 3 * HIDDEN)
        wo = wmat(wr + HIDDEN, HIDDEN, HIDDEN)
        w1 = wmat(wr + 2 * HIDDEN, HIDDEN, INTERMEDIATE)
        w2 = wmat(wr + 3 * HIDDEN, INTERMEDIATE, HIDDEN)
        bqkv = bvec(br + 0, 3 * HIDDEN)
        bo = bvec(br + 1, HIDDEN)
        ln1_g, ln1_b = bvec(br + 2, HIDDEN), bvec(br + 3, HIDDEN)
        b1 = bvec(br + 4, INTERMEDIATE)
        b2 = bvec(br + 5, HIDDEN)
        ln2_g, ln2_b = bvec(br + 6, HIDDEN), bvec(br + 7, HIDDEN)

        # fused Q|K|V projection: one (S, H) x (H, 3H) matmul
        qkv = jnp.dot(x, wqkv, preferred_element_type=f32) + bqkv        # (S, 3H)

        # per-head attention; each head's context is scattered into the VMEM
        # scratch ctx buffer at its final column offset (no lane concatenates)
        for h in range(N_HEADS):
            c0 = h * HEAD_DIM
            qh = qkv[:, c0:c0 + HEAD_DIM]                                 # (S, Dh)
            kh = qkv[:, HIDDEN + c0:HIDDEN + c0 + HEAD_DIM]               # (S, Dh)
            vh = qkv[:, 2 * HIDDEN + c0:2 * HIDDEN + c0 + HEAD_DIM]       # (S, Dh)
            s = jax.lax.dot_general(qh, kh, contract_last,
                                    preferred_element_type=f32) * scale + mask
            s = s - jnp.max(s, axis=-1, keepdims=True)
            p = jnp.exp(s)
            p = p * pl.reciprocal(jnp.sum(p, axis=-1, keepdims=True), approx=False)
            ctx_ref[:, c0:c0 + HEAD_DIM] = jnp.dot(p, vh, preferred_element_type=f32)

        # attention output projection + residual + LayerNorm (fused)
        attn_out = jnp.dot(ctx_ref[...], wo, preferred_element_type=f32) + bo
        # attention-output dropout: identity in eval mode
        x = layer_norm(x + attn_out, ln1_g, ln1_b)

        # FFN + residual + LayerNorm (fused)
        h1 = gelu(jnp.dot(x, w1, preferred_element_type=f32) + b1)
        h2 = jnp.dot(h1, w2, preferred_element_type=f32) + b2
        # FFN-output dropout: identity in eval mode
        x = layer_norm(x + h2, ln2_g, ln2_b)

    # BERT pooler (dense + tanh on [CLS]) + classifier, lane-dense 128-wide store
    pool_w = wmat(W_POOL_ROW, HIDDEN, HIDDEN)
    out_w = w_ref[W_OUT_ROW:W_OUT_ROW + HIDDEN, :]                        # (H, 128) zero-padded
    pool_b = bvec(B_POOL_ROW, HIDDEN)
    out_b = b_ref[B_OUT_ROW:B_OUT_ROW + 1, :]                             # (1, 128) zero-padded
    cls = x[0:1, :]
    pooled = jnp.tanh(jnp.dot(cls, pool_w, preferred_element_type=f32) + pool_b)
    # TODO(synk): nn.Dropout(p=0.3) is identity in eval mode; training-mode RNG dropout not implemented.
    logits = jnp.dot(pooled, out_w, preferred_element_type=f32) + out_b   # (1, 128), cols 3.. are 0
    out_ref[...] = logits.astype(out_ref.dtype)


# ---------------- parameters (synthetic, deterministic, pre-packed slabs) ----------------
def init_params(key):
    keys = iter(jax.random.split(key, 8 + N_LAYERS * 8))

    def nrm(*shape):
        return (0.02 * jax.random.normal(next(keys), shape)).astype(jnp.float32)

    w_slab = jnp.zeros((W_TOTAL_ROWS, LANE), jnp.float32)
    b_slab = jnp.zeros((B_TOTAL_ROWS, LANE), jnp.float32)

    def put_w(slab, row, mat):
        return slab.at[row:row + mat.shape[0], :mat.shape[1]].set(mat)

    def put_b(slab, row, vec):
        return slab.at[row, :vec.shape[0]].set(vec)

    ones_h = jnp.ones((HIDDEN,), jnp.float32)

    # embedding LayerNorm: gamma = 1 (row 0), beta = 0 (row 1, already zero)
    b_slab = put_b(b_slab, 0, ones_h)

    for l in range(N_LAYERS):
        wr = l * W_ROWS_PER_LAYER
        br = 2 + l * B_ROWS_PER_LAYER
        w_slab = put_w(w_slab, wr, nrm(HIDDEN, 3 * HIDDEN))               # wqkv
        w_slab = put_w(w_slab, wr + HIDDEN, nrm(HIDDEN, HIDDEN))          # wo
        w_slab = put_w(w_slab, wr + 2 * HIDDEN, nrm(HIDDEN, INTERMEDIATE))  # w1
        w_slab = put_w(w_slab, wr + 3 * HIDDEN, nrm(INTERMEDIATE, HIDDEN))  # w2
        # biases start at zero; LayerNorm gammas = 1
        b_slab = put_b(b_slab, br + 2, ones_h)                            # ln1_g
        b_slab = put_b(b_slab, br + 6, ones_h)                            # ln2_g

    w_slab = put_w(w_slab, W_POOL_ROW, nrm(HIDDEN, HIDDEN))               # pool_w
    w_slab = put_w(w_slab, W_OUT_ROW, nrm(HIDDEN, N_CLASSES))             # out_w (zero-padded)
    # pool_b / out_b rows stay zero

    return {
        "word_emb": nrm(VOCAB, HIDDEN),
        "pos_emb": nrm(MAX_POS, HIDDEN),
        "type_emb": nrm(2, HIDDEN),
        "w_slab": w_slab,
        "b_slab": b_slab,
    }


# ---------------- forward (single pallas_call, grid over batch) ----------------
@jax.jit
def entity_sentiment_forward(params, input_ids, attention_mask):
    B, S = input_ids.shape
    token_type_ids = jnp.zeros_like(input_ids)

    # embedding table gather + sum stays in plain JAX glue
    emb = (params["word_emb"][input_ids]
           + params["pos_emb"][:S][None, :, :]
           + params["type_emb"][token_type_ids]).astype(jnp.float32)          # (B, S, H)
    add_mask = ((1.0 - attention_mask.astype(jnp.float32)) * -10000.0)[:, None, :]  # (B, 1, S)

    w_slab = params["w_slab"]
    b_slab = params["b_slab"]

    flops = B * (N_LAYERS * (2 * S * HIDDEN * 3 * HIDDEN
                             + 4 * N_HEADS * S * S * HEAD_DIM
                             + 2 * S * HIDDEN * HIDDEN
                             + 4 * S * HIDDEN * INTERMEDIATE)
                 + 2 * HIDDEN * HIDDEN + 2 * HIDDEN * LANE)
    transcendentals = B * (N_LAYERS * (N_HEADS * S * S + S * INTERMEDIATE) + HIDDEN)
    bytes_accessed = 4 * (emb.size + add_mask.size + w_slab.size + b_slab.size + B * LANE)

    out = pl.pallas_call(
        _fused_forward_kernel,
        out_shape=jax.ShapeDtypeStruct((B, 1, LANE), jnp.float32),
        grid=(B,),
        in_specs=[
            pl.BlockSpec((None, S, HIDDEN), lambda b: (b, 0, 0)),   # per-batch activations
            pl.BlockSpec((None, 1, S), lambda b: (b, 0, 0)),        # per-batch additive mask
            pl.BlockSpec(w_slab.shape, lambda b: (0, 0)),           # weight slab (VMEM-resident)
            pl.BlockSpec(b_slab.shape, lambda b: (0, 0)),           # bias/LN slab (VMEM-resident)
        ],
        out_specs=pl.BlockSpec((None, 1, LANE), lambda b: (b, 0, 0)),
        scratch_shapes=[pltpu.VMEM((S, HIDDEN), jnp.float32)],      # attention context buffer
        compiler_params=pltpu.CompilerParams(dimension_semantics=("parallel",)),
        cost_estimate=pl.CostEstimate(flops=flops,
                                      transcendentals=transcendentals,
                                      bytes_accessed=bytes_accessed),
    )(emb, add_mask, w_slab, b_slab)

    return out[:, 0, :N_CLASSES]


if __name__ == "__main__":
    key = jax.random.PRNGKey(0)
    pkey, ikey = jax.random.split(key)
    params = init_params(pkey)

    B, S = 2, 8
    input_ids = jax.random.randint(ikey, (B, S), 0, VOCAB, dtype=jnp.int32)
    attention_mask = jnp.array([[1, 1, 1, 1, 1, 1, 1, 1],
                                [1, 1, 1, 1, 1, 0, 0, 0]], dtype=jnp.int32)

    logits = entity_sentiment_forward(params, input_ids, attention_mask)
    jax.block_until_ready(logits)
    assert logits.shape == (B, N_CLASSES)
    print("KERNEL_OK")
</pallas_src>

<mosaic_0001>
module attributes {stable_mosaic.version = 11 : i64} {
  func.func @_fused_forward_kernel(%arg0: i32, %arg1: memref<1x8x32xf32, #tpu.memory_space<vmem>>, %arg2: memref<1x1x8xf32, #tpu.memory_space<vmem>>, %arg3: memref<384x128xf32, #tpu.memory_space<vmem>>, %arg4: memref<24x128xf32, #tpu.memory_space<vmem>>, %arg5: memref<1x1x128xf32, #tpu.memory_space<vmem>>, %arg6: memref<8x32xf32, #tpu.memory_space<vmem>>) attributes {dimension_semantics = [#tpu.dimension_semantics<parallel>], iteration_bounds = array<i64: 2>, scalar_prefetch = 0 : i64, scratch_operands = 1 : i64, tpu.core_type = #tpu.core_type<tc>, window_params = [{transform_indices = @transform_0, window_bounds = array<i64: 1, 8, 32>}, {transform_indices = @transform_1, window_bounds = array<i64: 1, 1, 8>}, {pipeline_mode = #tpu.pipeline_mode<synchronous>, transform_indices = @transform_2, window_bounds = array<i64: 384, 128>}, {pipeline_mode = #tpu.pipeline_mode<synchronous>, transform_indices = @transform_3, window_bounds = array<i64: 24, 128>}, {transform_indices = @transform_4, window_bounds = array<i64: 1, 1, 128>}]} {
    %c0 = arith.constant 0 : index
    %c0_0 = arith.constant 0 : index
    %c0_1 = arith.constant 0 : index
    %0 = vector.load %arg1[%c0, %c0_0, %c0_1] : memref<1x8x32xf32, #tpu.memory_space<vmem>>, vector<1x8x32xf32>
    %1 = vector.shape_cast %0 : vector<1x8x32xf32> to vector<8x32xf32>
    %c0_2 = arith.constant 0 : index
    %c0_3 = arith.constant 0 : index
    %c0_4 = arith.constant 0 : index
    %2 = vector.load %arg2[%c0_2, %c0_3, %c0_4] : memref<1x1x8xf32, #tpu.memory_space<vmem>>, vector<1x1x8xf32>
    %3 = vector.shape_cast %2 : vector<1x1x8xf32> to vector<1x8xf32>
    %c0_5 = arith.constant 0 : index
    %c0_6 = arith.constant 0 : index
    %4 = vector.load %arg4[%c0_5, %c0_6] : memref<24x128xf32, #tpu.memory_space<vmem>>, vector<1x32xf32>
    %c1 = arith.constant 1 : index
    %c0_7 = arith.constant 0 : index
    %5 = vector.load %arg4[%c1, %c0_7] : memref<24x128xf32, #tpu.memory_space<vmem>>, vector<1x32xf32>
    %cst = arith.constant dense<0.000000e+00> : vector<8xf32>
    %6 = vector.multi_reduction <add>, %1, %cst [1] : vector<8x32xf32> to vector<8xf32>
    %7 = vector.shape_cast %6 : vector<8xf32> to vector<8x1xf32>
    %cst_8 = arith.constant 3.200000e+01 : f32
    %8 = vector.broadcast %cst_8 : f32 to vector<8x1xf32>
    %9 = arith.divf %7, %8 : vector<8x1xf32>
    %10 = vector.broadcast %9 : vector<8x1xf32> to vector<8x32xf32>
    %11 = arith.subf %1, %10 : vector<8x32xf32>
    %12 = arith.mulf %11, %11 : vector<8x32xf32>
    %cst_9 = arith.constant dense<0.000000e+00> : vector<8xf32>
    %13 = vector.multi_reduction <add>, %12, %cst_9 [1] : vector<8x32xf32> to vector<8xf32>
    %14 = vector.shape_cast %13 : vector<8xf32> to vector<8x1xf32>
    %cst_10 = arith.constant 3.200000e+01 : f32
    %15 = vector.broadcast %cst_10 : f32 to vector<8x1xf32>
    %16 = arith.divf %14, %15 : vector<8x1xf32>
    %17 = vector.broadcast %9 : vector<8x1xf32> to vector<8x32xf32>
    %18 = arith.subf %1, %17 : vector<8x32xf32>
    %cst_11 = arith.constant 9.99999996E-13 : f32
    %19 = vector.broadcast %cst_11 : f32 to vector<8x1xf32>
    %20 = arith.addf %16, %19 : vector<8x1xf32>
    %21 = math.rsqrt %20 : vector<8x1xf32>
    %22 = vector.broadcast %21 : vector<8x1xf32> to vector<8x32xf32>
    %23 = arith.mulf %18, %22 : vector<8x32xf32>
    %24 = vector.broadcast %4 : vector<1x32xf32> to vector<8x32xf32>
    %25 = arith.mulf %23, %24 : vector<8x32xf32>
    %26 = vector.broadcast %5 : vector<1x32xf32> to vector<8x32xf32>
    %27 = arith.addf %25, %26 : vector<8x32xf32>
    %c0_12 = arith.constant 0 : index
    %c0_13 = arith.constant 0 : index
    %28 = vector.load %arg3[%c0_12, %c0_13] : memref<384x128xf32, #tpu.memory_space<vmem>>, vector<32x96xf32>
    %c32 = arith.constant 32 : index
    %c0_14 = arith.constant 0 : index
    %29 = vector.load %arg3[%c32, %c0_14] : memref<384x128xf32, #tpu.memory_space<vmem>>, vector<32x32xf32>
    %c64 = arith.constant 64 : index
    %c0_15 = arith.constant 0 : index
    %30 = vector.load %arg3[%c64, %c0_15] : memref<384x128xf32, #tpu.memory_space<vmem>>, vector<32x64xf32>
    %c96 = arith.constant 96 : index
    %c0_16 = arith.constant 0 : index
    %31 = vector.load %arg3[%c96, %c0_16] : memref<384x128xf32, #tpu.memory_space<vmem>>, vector<64x32xf32>
    %c2 = arith.constant 2 : index
    %c0_17 = arith.constant 0 : index
    %32 = vector.load %arg4[%c2, %c0_17] : memref<24x128xf32, #tpu.memory_space<vmem>>, vector<1x96xf32>
    %c3 = arith.constant 3 : index
    %c0_18 = arith.constant 0 : index
    %33 = vector.load %arg4[%c3, %c0_18] : memref<24x128xf32, #tpu.memory_space<vmem>>, vector<1x32xf32>
    %c4 = arith.constant 4 : index
    %c0_19 = arith.constant 0 : index
    %34 = vector.load %arg4[%c4, %c0_19] : memref<24x128xf32, #tpu.memory_space<vmem>>, vector<1x32xf32>
    %c5 = arith.constant 5 : index
    %c0_20 = arith.constant 0 : index
    %35 = vector.load %arg4[%c5, %c0_20] : memref<24x128xf32, #tpu.memory_space<vmem>>, vector<1x32xf32>
    %c6 = arith.constant 6 : index
    %c0_21 = arith.constant 0 : index
    %36 = vector.load %arg4[%c6, %c0_21] : memref<24x128xf32, #tpu.memory_space<vmem>>, vector<1x64xf32>
    %c7 = arith.constant 7 : index
    %c0_22 = arith.constant 0 : index
    %37 = vector.load %arg4[%c7, %c0_22] : memref<24x128xf32, #tpu.memory_space<vmem>>, vector<1x32xf32>
    %c8 = arith.constant 8 : index
    %c0_23 = arith.constant 0 : index
    %38 = vector.load %arg4[%c8, %c0_23] : memref<24x128xf32, #tpu.memory_space<vmem>>, vector<1x32xf32>
    %c9 = arith.constant 9 : index
    %c0_24 = arith.constant 0 : index
    %39 = vector.load %arg4[%c9, %c0_24] : memref<24x128xf32, #tpu.memory_space<vmem>>, vector<1x32xf32>
    %cst_25 = arith.constant dense<0.000000e+00> : vector<8x96xf32>
    %40 = tpu.matmul %27, %28, %cst_25 {dimension_numbers = #tpu.dot_dimension_numbers<[1], [0], [0], [1], [0, 0, 1, 1], [], []>} : vector<8x32xf32>, vector<32x96xf32>, vector<8x96xf32> -> vector<8x96xf32>
    %41 = vector.broadcast %32 : vector<1x96xf32> to vector<8x96xf32>
    %42 = arith.addf %40, %41 : vector<8x96xf32>
    %43 = vector.extract_strided_slice %42 {offsets = [0, 0], sizes = [8, 8], strides = [1, 1]} : vector<8x96xf32> to vector<8x8xf32>
    %44 = vector.extract_strided_slice %42 {offsets = [0, 32], sizes = [8, 8], strides = [1, 1]} : vector<8x96xf32> to vector<8x8xf32>
    %45 = vector.extract_strided_slice %42 {offsets = [0, 64], sizes = [8, 8], strides = [1, 1]} : vector<8x96xf32> to vector<8x8xf32>
    %cst_26 = arith.constant dense<0.000000e+00> : vector<8x8xf32>
    %46 = tpu.matmul %43, %44, %cst_26 {dimension_numbers = #tpu.dot_dimension_numbers<[1], [1], [0], [0], [0, 0, 1, 0], [], []>} : vector<8x8xf32>, vector<8x8xf32>, vector<8x8xf32> -> vector<8x8xf32>
    %cst_27 = arith.constant 0.353553385 : f32
    %47 = vector.broadcast %cst_27 : f32 to vector<8x8xf32>
    %48 = arith.mulf %46, %47 : vector<8x8xf32>
    %49 = vector.broadcast %3 : vector<1x8xf32> to vector<8x8xf32>
    %50 = arith.addf %48, %49 : vector<8x8xf32>
    %cst_28 = arith.constant dense<0xFF800000> : vector<8xf32>
    %51 = vector.multi_reduction <maximumf>, %50, %cst_28 [1] : vector<8x8xf32> to vector<8xf32>
    %52 = vector.shape_cast %51 : vector<8xf32> to vector<8x1xf32>
    %53 = vector.broadcast %52 : vector<8x1xf32> to vector<8x8xf32>
    %54 = arith.subf %50, %53 : vector<8x8xf32>
    %55 = math.exp %54 : vector<8x8xf32>
    %cst_29 = arith.constant dense<0.000000e+00> : vector<8xf32>
    %56 = vector.multi_reduction <add>, %55, %cst_29 [1] : vector<8x8xf32> to vector<8xf32>
    %57 = vector.shape_cast %56 : vector<8xf32> to vector<8x1xf32>
    %58 = tpu.reciprocal %57 : vector<8x1xf32> -> vector<8x1xf32>
    %59 = vector.broadcast %58 : vector<8x1xf32> to vector<8x8xf32>
    %60 = arith.mulf %55, %59 : vector<8x8xf32>
    %cst_30 = arith.constant dense<0.000000e+00> : vector<8x8xf32>
    %61 = tpu.matmul %60, %45, %cst_30 {dimension_numbers = #tpu.dot_dimension_numbers<[1], [0], [0], [1], [0, 0, 1, 1], [], []>} : vector<8x8xf32>, vector<8x8xf32>, vector<8x8xf32> -> vector<8x8xf32>
    %c0_31 = arith.constant 0 : index
    %c0_32 = arith.constant 0 : index
    %62 = vector.load %arg6[%c0_31, %c0_32] : memref<8x32xf32, #tpu.memory_space<vmem>>, vector<8x8xf32>
    tpu.vector_store %arg6[%c0_31, %c0_32], %61 {strides = array<i32>} : memref<8x32xf32, #tpu.memory_space<vmem>>, vector<8x8xf32>,
    %63 = vector.extract_strided_slice %42 {offsets = [0, 8], sizes = [8, 8], strides = [1, 1]} : vector<8x96xf32> to vector<8x8xf32>
    %64 = vector.extract_strided_slice %42 {offsets = [0, 40], sizes = [8, 8], strides = [1, 1]} : vector<8x96xf32> to vector<8x8xf32>
    %65 = vector.extract_strided_slice %42 {offsets = [0, 72], sizes = [8, 8], strides = [1, 1]} : vector<8x96xf32> to vector<8x8xf32>
    %cst_33 = arith.constant dense<0.000000e+00> : vector<8x8xf32>
    %66 = tpu.matmul %63, %64, %cst_33 {dimension_numbers = #tpu.dot_dimension_numbers<[1], [1], [0], [0], [0, 0, 1, 0], [], []>} : vector<8x8xf32>, vector<8x8xf32>, vector<8x8xf32> -> vector<8x8xf32>
    %cst_34 = arith.constant 0.353553385 : f32
    %67 = vector.broadcast %cst_34 : f32 to vector<8x8xf32>
    %68 = arith.mulf %66, %67 : vector<8x8xf32>
    %69 = vector.broadcast %3 : vector<1x8xf32> to vector<8x8xf32>
    %70 = arith.addf %68, %69 : vector<8x8xf32>
    %cst_35 = arith.constant dense<0xFF800000> : vector<8xf32>
    %71 = vector.multi_reduction <maximumf>, %70, %cst_35 [1] : vector<8x8xf32> to vector<8xf32>
    %72 = vector.shape_cast %71 : vector<8xf32> to vector<8x1xf32>
    %73 = vector.broadcast %72 : vector<8x1xf32> to vector<8x8xf32>
    %74 = arith.subf %70, %73 : vector<8x8xf32>
    %75 = math.exp %74 : vector<8x8xf32>
    %cst_36 = arith.constant dense<0.000000e+00> : vector<8xf32>
    %76 = vector.multi_reduction <add>, %75, %cst_36 [1] : vector<8x8xf32> to vector<8xf32>
    %77 = vector.shape_cast %76 : vector<8xf32> to vector<8x1xf32>
    %78 = tpu.reciprocal %77 : vector<8x1xf32> -> vector<8x1xf32>
    %79 = vector.broadcast %78 : vector<8x1xf32> to vector<8x8xf32>
    %80 = arith.mulf %75, %79 : vector<8x8xf32>
    %cst_37 = arith.constant dense<0.000000e+00> : vector<8x8xf32>
    %81 = tpu.matmul %80, %65, %cst_37 {dimension_numbers = #tpu.dot_dimension_numbers<[1], [0], [0], [1], [0, 0, 1, 1], [], []>} : vector<8x8xf32>, vector<8x8xf32>, vector<8x8xf32> -> vector<8x8xf32>
    %c0_38 = arith.constant 0 : index
    %c8_39 = arith.constant 8 : index
    %82 = vector.load %arg6[%c0_38, %c8_39] : memref<8x32xf32, #tpu.memory_space<vmem>>, vector<8x8xf32>
    tpu.vector_store %arg6[%c0_38, %c8_39], %81 {strides = array<i32>} : memref<8x32xf32, #tpu.memory_space<vmem>>, vector<8x8xf32>,
    %83 = vector.extract_strided_slice %42 {offsets = [0, 16], sizes = [8, 8], strides = [1, 1]} : vector<8x96xf32> to vector<8x8xf32>
    %84 = vector.extract_strided_slice %42 {offsets = [0, 48], sizes = [8, 8], strides = [1, 1]} : vector<8x96xf32> to vector<8x8xf32>
    %85 = vector.extract_strided_slice %42 {offsets = [0, 80], sizes = [8, 8], strides = [1, 1]} : vector<8x96xf32> to vector<8x8xf32>
    %cst_40 = arith.constant dense<0.000000e+00> : vector<8x8xf32>
    %86 = tpu.matmul %83, %84, %cst_40 {dimension_numbers = #tpu.dot_dimension_numbers<[1], [1], [0], [0], [0, 0, 1, 0], [], []>} : vector<8x8xf32>, vector<8x8xf32>, vector<8x8xf32> -> vector<8x8xf32>
    %cst_41 = arith.constant 0.353553385 : f32
    %87 = vector.broadcast %cst_41 : f32 to vector<8x8xf32>
    %88 = arith.mulf %86, %87 : vector<8x8xf32>
    %89 = vector.broadcast %3 : vector<1x8xf32> to vector<8x8xf32>
    %90 = arith.addf %88, %89 : vector<8x8xf32>
    %cst_42 = arith.constant dense<0xFF800000> : vector<8xf32>
    %91 = vector.multi_reduction <maximumf>, %90, %cst_42 [1] : vector<8x8xf32> to vector<8xf32>
    %92 = vector.shape_cast %91 : vector<8xf32> to vector<8x1xf32>
    %93 = vector.broadcast %92 : vector<8x1xf32> to vector<8x8xf32>
    %94 = arith.subf %90, %93 : vector<8x8xf32>
    %95 = math.exp %94 : vector<8x8xf32>
    %cst_43 = arith.constant dense<0.000000e+00> : vector<8xf32>
    %96 = vector.multi_reduction <add>, %95, %cst_43 [1] : vector<8x8xf32> to vector<8xf32>
    %97 = vector.shape_cast %96 : vector<8xf32> to vector<8x1xf32>
    %98 = tpu.reciprocal %97 : vector<8x1xf32> -> vector<8x1xf32>
    %99 = vector.broadcast %98 : vector<8x1xf32> to vector<8x8xf32>
    %100 = arith.mulf %95, %99 : vector<8x8xf32>
    %cst_44 = arith.constant dense<0.000000e+00> : vector<8x8xf32>
    %101 = tpu.matmul %100, %85, %cst_44 {dimension_numbers = #tpu.dot_dimension_numbers<[1], [0], [0], [1], [0, 0, 1, 1], [], []>} : vector<8x8xf32>, vector<8x8xf32>, vector<8x8xf32> -> vector<8x8xf32>
    %c0_45 = arith.constant 0 : index
    %c16 = arith.constant 16 : index
    %102 = vector.load %arg6[%c0_45, %c16] : memref<8x32xf32, #tpu.memory_space<vmem>>, vector<8x8xf32>
    tpu.vector_store %arg6[%c0_45, %c16], %101 {strides = array<i32>} : memref<8x32xf32, #tpu.memory_space<vmem>>, vector<8x8xf32>,
    %103 = vector.extract_strided_slice %42 {offsets = [0, 24], sizes = [8, 8], strides = [1, 1]} : vector<8x96xf32> to vector<8x8xf32>
    %104 = vector.extract_strided_slice %42 {offsets = [0, 56], sizes = [8, 8], strides = [1, 1]} : vector<8x96xf32> to vector<8x8xf32>
    %105 = vector.extract_strided_slice %42 {offsets = [0, 88], sizes = [8, 8], strides = [1, 1]} : vector<8x96xf32> to vector<8x8xf32>
    %cst_46 = arith.constant dense<0.000000e+00> : vector<8x8xf32>
    %106 = tpu.matmul %103, %104, %cst_46 {dimension_numbers = #tpu.dot_dimension_numbers<[1], [1], [0], [0], [0, 0, 1, 0], [], []>} : vector<8x8xf32>, vector<8x8xf32>, vector<8x8xf32> -> vector<8x8xf32>
    %cst_47 = arith.constant 0.353553385 : f32
    %107 = vector.broadcast %cst_47 : f32 to vector<8x8xf32>
    %108 = arith.mulf %106, %107 : vector<8x8xf32>
    %109 = vector.broadcast %3 : vector<1x8xf32> to vector<8x8xf32>
    %110 = arith.addf %108, %109 : vector<8x8xf32>
    %cst_48 = arith.constant dense<0xFF800000> : vector<8xf32>
    %111 = vector.multi_reduction <maximumf>, %110, %cst_48 [1] : vector<8x8xf32> to vector<8xf32>
    %112 = vector.shape_cast %111 : vector<8xf32> to vector<8x1xf32>
    %113 = vector.broadcast %112 : vector<8x1xf32> to vector<8x8xf32>
    %114 = arith.subf %110, %113 : vector<8x8xf32>
    %115 = math.exp %114 : vector<8x8xf32>
    %cst_49 = arith.constant dense<0.000000e+00> : vector<8xf32>
    %116 = vector.multi_reduction <add>, %115, %cst_49 [1] : vector<8x8xf32> to vector<8xf32>
    %117 = vector.shape_cast %116 : vector<8xf32> to vector<8x1xf32>
    %118 = tpu.reciprocal %117 : vector<8x1xf32> -> vector<8x1xf32>
    %119 = vector.broadcast %118 : vector<8x1xf32> to vector<8x8xf32>
    %120 = arith.mulf %115, %119 : vector<8x8xf32>
    %cst_50 = arith.constant dense<0.000000e+00> : vector<8x8xf32>
    %121 = tpu.matmul %120, %105, %cst_50 {dimension_numbers = #tpu.dot_dimension_numbers<[1], [0], [0], [1], [0, 0, 1, 1], [], []>} : vector<8x8xf32>, vector<8x8xf32>, vector<8x8xf32> -> vector<8x8xf32>
    %c0_51 = arith.constant 0 : index
    %c24 = arith.constant 24 : index
    %122 = vector.load %arg6[%c0_51, %c24] : memref<8x32xf32, #tpu.memory_space<vmem>>, vector<8x8xf32>
    tpu.vector_store %arg6[%c0_51, %c24], %121 {strides = array<i32>} : memref<8x32xf32, #tpu.memory_space<vmem>>, vector<8x8xf32>,
    %c0_52 = arith.constant 0 : index
    %c0_53 = arith.constant 0 : index
    %123 = vector.load %arg6[%c0_52, %c0_53] : memref<8x32xf32, #tpu.memory_space<vmem>>, vector<8x32xf32>
    %cst_54 = arith.constant dense<0.000000e+00> : vector<8x32xf32>
    %124 = tpu.matmul %123, %29, %cst_54 {dimension_numbers = #tpu.dot_dimension_numbers<[1], [0], [0], [1], [0, 0, 1, 1], [], []>} : vector<8x32xf32>, vector<32x32xf32>, vector<8x32xf32> -> vector<8x32xf32>
    %125 = vector.broadcast %33 : vector<1x32xf32> to vector<8x32xf32>
    %126 = arith.addf %124, %125 : vector<8x32xf32>
    %127 = arith.addf %27, %126 : vector<8x32xf32>
    %cst_55 = arith.constant dense<0.000000e+00> : vector<8xf32>
    %128 = vector.multi_reduction <add>, %127, %cst_55 [1] : vector<8x32xf32> to vector<8xf32>
    %129 = vector.shape_cast %128 : vector<8xf32> to vector<8x1xf32>
    %cst_56 = arith.constant 3.200000e+01 : f32
    %130 = vector.broadcast %cst_56 : f32 to vector<8x1xf32>
    %131 = arith.divf %129, %130 : vector<8x1xf32>
    %132 = vector.broadcast %131 : vector<8x1xf32> to vector<8x32xf32>
    %133 = arith.subf %127, %132 : vector<8x32xf32>
    %134 = arith.mulf %133, %133 : vector<8x32xf32>
    %cst_57 = arith.constant dense<0.000000e+00> : vector<8xf32>
    %135 = vector.multi_reduction <add>, %134, %cst_57 [1] : vector<8x32xf32> to vector<8xf32>
    %136 = vector.shape_cast %135 : vector<8xf32> to vector<8x1xf32>
    %cst_58 = arith.constant 3.200000e+01 : f32
    %137 = vector.broadcast %cst_58 : f32 to vector<8x1xf32>
    %138 = arith.divf %136, %137 : vector<8x1xf32>
    %139 = vector.broadcast %131 : vector<8x1xf32> to vector<8x32xf32>
    %140 = arith.subf %127, %139 : vector<8x32xf32>
    %cst_59 = arith.constant 9.99999996E-13 : f32
    %141 = vector.broadcast %cst_59 : f32 to vector<8x1xf32>
    %142 = arith.addf %138, %141 : vector<8x1xf32>
    %143 = math.rsqrt %142 : vector<8x1xf32>
    %144 = vector.broadcast %143 : vector<8x1xf32> to vector<8x32xf32>
    %145 = arith.mulf %140, %144 : vector<8x32xf32>
    %146 = vector.broadcast %34 : vector<1x32xf32> to vector<8x32xf32>
    %147 = arith.mulf %145, %146 : vector<8x32xf32>
    %148 = vector.broadcast %35 : vector<1x32xf32> to vector<8x32xf32>
    %149 = arith.addf %147, %148 : vector<8x32xf32>
    %cst_60 = arith.constant dense<0.000000e+00> : vector<8x64xf32>
    %150 = tpu.matmul %149, %30, %cst_60 {dimension_numbers = #tpu.dot_dimension_numbers<[1], [0], [0], [1], [0, 0, 1, 1], [], []>} : vector<8x32xf32>, vector<32x64xf32>, vector<8x64xf32> -> vector<8x64xf32>
    %151 = vector.broadcast %36 : vector<1x64xf32> to vector<8x64xf32>
    %152 = arith.addf %150, %151 : vector<8x64xf32>
    %cst_61 = arith.constant 5.000000e-01 : f32
    %153 = vector.broadcast %cst_61 : f32 to vector<8x64xf32>
    %154 = arith.mulf %153, %152 : vector<8x64xf32>
    %cst_62 = arith.constant 4.471500e-02 : f32
    %155 = vector.broadcast %cst_62 : f32 to vector<8x64xf32>
    %156 = arith.mulf %155, %152 : vector<8x64xf32>
    %157 = arith.mulf %156, %152 : vector<8x64xf32>
    %158 = arith.mulf %157, %152 : vector<8x64xf32>
    %159 = arith.addf %152, %158 : vector<8x64xf32>
    %cst_63 = arith.constant 0.797884583 : f32
    %160 = vector.broadcast %cst_63 : f32 to vector<8x64xf32>
    %161 = arith.mulf %160, %159 : vector<8x64xf32>
    %162 = math.tanh %161 : vector<8x64xf32>
    %cst_64 = arith.constant 1.000000e+00 : f32
    %163 = vector.broadcast %cst_64 : f32 to vector<8x64xf32>
    %164 = arith.addf %163, %162 : vector<8x64xf32>
    %165 = arith.mulf %154, %164 : vector<8x64xf32>
    %cst_65 = arith.constant dense<0.000000e+00> : vector<8x32xf32>
    %166 = tpu.matmul %165, %31, %cst_65 {dimension_numbers = #tpu.dot_dimension_numbers<[1], [0], [0], [1], [0, 0, 1, 1], [], []>} : vector<8x64xf32>, vector<64x32xf32>, vector<8x32xf32> -> vector<8x32xf32>
    %167 = vector.broadcast %37 : vector<1x32xf32> to vector<8x32xf32>
    %168 = arith.addf %166, %167 : vector<8x32xf32>
    %169 = arith.addf %149, %168 : vector<8x32xf32>
    %cst_66 = arith.constant dense<0.000000e+00> : vector<8xf32>
    %170 = vector.multi_reduction <add>, %169, %cst_66 [1] : vector<8x32xf32> to vector<8xf32>
    %171 = vector.shape_cast %170 : vector<8xf32> to vector<8x1xf32>
    %cst_67 = arith.constant 3.200000e+01 : f32
    %172 = vector.broadcast %cst_67 : f32 to vector<8x1xf32>
    %173 = arith.divf %171, %172 : vector<8x1xf32>
    %174 = vector.broadcast %173 : vector<8x1xf32> to vector<8x32xf32>
    %175 = arith.subf %169, %174 : vector<8x32xf32>
    %176 = arith.mulf %175, %175 : vector<8x32xf32>
    %cst_68 = arith.constant dense<0.000000e+00> : vector<8xf32>
    %177 = vector.multi_reduction <add>, %176, %cst_68 [1] : vector<8x32xf32> to vector<8xf32>
    %178 = vector.shape_cast %177 : vector<8xf32> to vector<8x1xf32>
    %cst_69 = arith.constant 3.200000e+01 : f32
    %179 = vector.broadcast %cst_69 : f32 to vector<8x1xf32>
    %180 = arith.divf %178, %179 : vector<8x1xf32>
    %181 = vector.broadcast %173 : vector<8x1xf32> to vector<8x32xf32>
    %182 = arith.subf %169, %181 : vector<8x32xf32>
    %cst_70 = arith.constant 9.99999996E-13 : f32
    %183 = vector.broadcast %cst_70 : f32 to vector<8x1xf32>
    %184 = arith.addf %180, %183 : vector<8x1xf32>
    %185 = math.rsqrt %184 : vector<8x1xf32>
    %186 = vector.broadcast %185 : vector<8x1xf32> to vector<8x32xf32>
    %187 = arith.mulf %182, %186 : vector<8x32xf32>
    %188 = vector.broadcast %38 : vector<1x32xf32> to vector<8x32xf32>
    %189 = arith.mulf %187, %188 : vector<8x32xf32>
    %190 = vector.broadcast %39 : vector<1x32xf32> to vector<8x32xf32>
    %191 = arith.addf %189, %190 : vector<8x32xf32>
    %c160 = arith.constant 160 : index
    %c0_71 = arith.constant 0 : index
    %192 = vector.load %arg3[%c160, %c0_71] : memref<384x128xf32, #tpu.memory_space<vmem>>, vector<32x96xf32>
    %c192 = arith.constant 192 : index
    %c0_72 = arith.constant 0 : index
    %193 = vector.load %arg3[%c192, %c0_72] : memref<384x128xf32, #tpu.memory_space<vmem>>, vector<32x32xf32>
    %c224 = arith.constant 224 : index
    %c0_73 = arith.constant 0 : index
    %194 = vector.load %arg3[%c224, %c0_73] : memref<384x128xf32, #tpu.memory_space<vmem>>, vector<32x64xf32>
    %c256 = arith.constant 256 : index
    %c0_74 = arith.constant 0 : index
    %195 = vector.load %arg3[%c256, %c0_74] : memref<384x128xf32, #tpu.memory_space<vmem>>, vector<64x32xf32>
    %c10 = arith.constant 10 : index
    %c0_75 = arith.constant 0 : index
    %196 = vector.load %arg4[%c10, %c0_75] : memref<24x128xf32, #tpu.memory_space<vmem>>, vector<1x96xf32>
    %c11 = arith.constant 11 : index
    %c0_76 = arith.constant 0 : index
    %197 = vector.load %arg4[%c11, %c0_76] : memref<24x128xf32, #tpu.memory_space<vmem>>, vector<1x32xf32>
    %c12 = arith.constant 12 : index
    %c0_77 = arith.constant 0 : index
    %198 = vector.load %arg4[%c12, %c0_77] : memref<24x128xf32, #tpu.memory_space<vmem>>, vector<1x32xf32>
    %c13 = arith.constant 13 : index
    %c0_78 = arith.constant 0 : index
    %199 = vector.load %arg4[%c13, %c0_78] : memref<24x128xf32, #tpu.memory_space<vmem>>, vector<1x32xf32>
    %c14 = arith.constant 14 : index
    %c0_79 = arith.constant 0 : index
    %200 = vector.load %arg4[%c14, %c0_79] : memref<24x128xf32, #tpu.memory_space<vmem>>, vector<1x64xf32>
    %c15 = arith.constant 15 : index
    %c0_80 = arith.constant 0 : index
    %201 = vector.load %arg4[%c15, %c0_80] : memref<24x128xf32, #tpu.memory_space<vmem>>, vector<1x32xf32>
    %c16_81 = arith.constant 16 : index
    %c0_82 = arith.constant 0 : index
    %202 = vector.load %arg4[%c16_81, %c0_82] : memref<24x128xf32, #tpu.memory_space<vmem>>, vector<1x32xf32>
    %c17 = arith.constant 17 : index
    %c0_83 = arith.constant 0 : index
    %203 = vector.load %arg4[%c17, %c0_83] : memref<24x128xf32, #tpu.memory_space<vmem>>, vector<1x32xf32>
    %cst_84 = arith.constant dense<0.000000e+00> : vector<8x96xf32>
    %204 = tpu.matmul %191, %192, %cst_84 {dimension_numbers = #tpu.dot_dimension_numbers<[1], [0], [0], [1], [0, 0, 1, 1], [], []>} : vector<8x32xf32>, vector<32x96xf32>, vector<8x96xf32> -> vector<8x96xf32>
    %205 = vector.broadcast %196 : vector<1x96xf32> to vector<8x96xf32>
    %206 = arith.addf %204, %205 : vector<8x96xf32>
    %207 = vector.extract_strided_slice %206 {offsets = [0, 0], sizes = [8, 8], strides = [1, 1]} : vector<8x96xf32> to vector<8x8xf32>
    %208 = vector.extract_strided_slice %206 {offsets = [0, 32], sizes = [8, 8], strides = [1, 1]} : vector<8x96xf32> to vector<8x8xf32>
    %209 = vector.extract_strided_slice %206 {offsets = [0, 64], sizes = [8, 8], strides = [1, 1]} : vector<8x96xf32> to vector<8x8xf32>
    %cst_85 = arith.constant dense<0.000000e+00> : vector<8x8xf32>
    %210 = tpu.matmul %207, %208, %cst_85 {dimension_numbers = #tpu.dot_dimension_numbers<[1], [1], [0], [0], [0, 0, 1, 0], [], []>} : vector<8x8xf32>, vector<8x8xf32>, vector<8x8xf32> -> vector<8x8xf32>
    %cst_86 = arith.constant 0.353553385 : f32
    %211 = vector.broadcast %cst_86 : f32 to vector<8x8xf32>
    %212 = arith.mulf %210, %211 : vector<8x8xf32>
    %213 = vector.broadcast %3 : vector<1x8xf32> to vector<8x8xf32>
    %214 = arith.addf %212, %213 : vector<8x8xf32>
    %cst_87 = arith.constant dense<0xFF800000> : vector<8xf32>
    %215 = vector.multi_reduction <maximumf>, %214, %cst_87 [1] : vector<8x8xf32> to vector<8xf32>
    %216 = vector.shape_cast %215 : vector<8xf32> to vector<8x1xf32>
    %217 = vector.broadcast %216 : vector<8x1xf32> to vector<8x8xf32>
    %218 = arith.subf %214, %217 : vector<8x8xf32>
    %219 = math.exp %218 : vector<8x8xf32>
    %cst_88 = arith.constant dense<0.000000e+00> : vector<8xf32>
    %220 = vector.multi_reduction <add>, %219, %cst_88 [1] : vector<8x8xf32> to vector<8xf32>
    %221 = vector.shape_cast %220 : vector<8xf32> to vector<8x1xf32>
    %222 = tpu.reciprocal %221 : vector<8x1xf32> -> vector<8x1xf32>
    %223 = vector.broadcast %222 : vector<8x1xf32> to vector<8x8xf32>
    %224 = arith.mulf %219, %223 : vector<8x8xf32>
    %cst_89 = arith.constant dense<0.000000e+00> : vector<8x8xf32>
    %225 = tpu.matmul %224, %209, %cst_89 {dimension_numbers = #tpu.dot_dimension_numbers<[1], [0], [0], [1], [0, 0, 1, 1], [], []>} : vector<8x8xf32>, vector<8x8xf32>, vector<8x8xf32> -> vector<8x8xf32>
    %c0_90 = arith.constant 0 : index
    %c0_91 = arith.constant 0 : index
    %226 = vector.load %arg6[%c0_90, %c0_91] : memref<8x32xf32, #tpu.memory_space<vmem>>, vector<8x8xf32>
    tpu.vector_store %arg6[%c0_90, %c0_91], %225 {strides = array<i32>} : memref<8x32xf32, #tpu.memory_space<vmem>>, vector<8x8xf32>,
    %227 = vector.extract_strided_slice %206 {offsets = [0, 8], sizes = [8, 8], strides = [1, 1]} : vector<8x96xf32> to vector<8x8xf32>
    %228 = vector.extract_strided_slice %206 {offsets = [0, 40], sizes = [8, 8], strides = [1, 1]} : vector<8x96xf32> to vector<8x8xf32>
    %229 = vector.extract_strided_slice %206 {offsets = [0, 72], sizes = [8, 8], strides = [1, 1]} : vector<8x96xf32> to vector<8x8xf32>
    %cst_92 = arith.constant dense<0.000000e+00> : vector<8x8xf32>
    %230 = tpu.matmul %227, %228, %cst_92 {dimension_numbers = #tpu.dot_dimension_numbers<[1], [1], [0], [0], [0, 0, 1, 0], [], []>} : vector<8x8xf32>, vector<8x8xf32>, vector<8x8xf32> -> vector<8x8xf32>
    %cst_93 = arith.constant 0.353553385 : f32
    %231 = vector.broadcast %cst_93 : f32 to vector<8x8xf32>
    %232 = arith.mulf %230, %231 : vector<8x8xf32>
    %233 = vector.broadcast %3 : vector<1x8xf32> to vector<8x8xf32>
    %234 = arith.addf %232, %233 : vector<8x8xf32>
    %cst_94 = arith.constant dense<0xFF800000> : vector<8xf32>
    %235 = vector.multi_reduction <maximumf>, %234, %cst_94 [1] : vector<8x8xf32> to vector<8xf32>
    %236 = vector.shape_cast %235 : vector<8xf32> to vector<8x1xf32>
    %237 = vector.broadcast %236 : vector<8x1xf32> to vector<8x8xf32>
    %238 = arith.subf %234, %237 : vector<8x8xf32>
    %239 = math.exp %238 : vector<8x8xf32>
    %cst_95 = arith.constant dense<0.000000e+00> : vector<8xf32>
    %240 = vector.multi_reduction <add>, %239, %cst_95 [1] : vector<8x8xf32> to vector<8xf32>
    %241 = vector.shape_cast %240 : vector<8xf32> to vector<8x1xf32>
    %242 = tpu.reciprocal %241 : vector<8x1xf32> -> vector<8x1xf32>
    %243 = vector.broadcast %242 : vector<8x1xf32> to vector<8x8xf32>
    %244 = arith.mulf %239, %243 : vector<8x8xf32>
    %cst_96 = arith.constant dense<0.000000e+00> : vector<8x8xf32>
    %245 = tpu.matmul %244, %229, %cst_96 {dimension_numbers = #tpu.dot_dimension_numbers<[1], [0], [0], [1], [0, 0, 1, 1], [], []>} : vector<8x8xf32>, vector<8x8xf32>, vector<8x8xf32> -> vector<8x8xf32>
    %c0_97 = arith.constant 0 : index
    %c8_98 = arith.constant 8 : index
    %246 = vector.load %arg6[%c0_97, %c8_98] : memref<8x32xf32, #tpu.memory_space<vmem>>, vector<8x8xf32>
    tpu.vector_store %arg6[%c0_97, %c8_98], %245 {strides = array<i32>} : memref<8x32xf32, #tpu.memory_space<vmem>>, vector<8x8xf32>,
    %247 = vector.extract_strided_slice %206 {offsets = [0, 16], sizes = [8, 8], strides = [1, 1]} : vector<8x96xf32> to vector<8x8xf32>
    %248 = vector.extract_strided_slice %206 {offsets = [0, 48], sizes = [8, 8], strides = [1, 1]} : vector<8x96xf32> to vector<8x8xf32>
    %249 = vector.extract_strided_slice %206 {offsets = [0, 80], sizes = [8, 8], strides = [1, 1]} : vector<8x96xf32> to vector<8x8xf32>
    %cst_99 = arith.constant dense<0.000000e+00> : vector<8x8xf32>
    %250 = tpu.matmul %247, %248, %cst_99 {dimension_numbers = #tpu.dot_dimension_numbers<[1], [1], [0], [0], [0, 0, 1, 0], [], []>} : vector<8x8xf32>, vector<8x8xf32>, vector<8x8xf32> -> vector<8x8xf32>
    %cst_100 = arith.constant 0.353553385 : f32
    %251 = vector.broadcast %cst_100 : f32 to vector<8x8xf32>
    %252 = arith.mulf %250, %251 : vector<8x8xf32>
    %253 = vector.broadcast %3 : vector<1x8xf32> to vector<8x8xf32>
    %254 = arith.addf %252, %253 : vector<8x8xf32>
    %cst_101 = arith.constant dense<0xFF800000> : vector<8xf32>
    %255 = vector.multi_reduction <maximumf>, %254, %cst_101 [1] : vector<8x8xf32> to vector<8xf32>
    %256 = vector.shape_cast %255 : vector<8xf32> to vector<8x1xf32>
    %257 = vector.broadcast %256 : vector<8x1xf32> to vector<8x8xf32>
    %258 = arith.subf %254, %257 : vector<8x8xf32>
    %259 = math.exp %258 : vector<8x8xf32>
    %cst_102 = arith.constant dense<0.000000e+00> : vector<8xf32>
    %260 = vector.multi_reduction <add>, %259, %cst_102 [1] : vector<8x8xf32> to vector<8xf32>
    %261 = vector.shape_cast %260 : vector<8xf32> to vector<8x1xf32>
    %262 = tpu.reciprocal %261 : vector<8x1xf32> -> vector<8x1xf32>
    %263 = vector.broadcast %262 : vector<8x1xf32> to vector<8x8xf32>
    %264 = arith.mulf %259, %263 : vector<8x8xf32>
    %cst_103 = arith.constant dense<0.000000e+00> : vector<8x8xf32>
    %265 = tpu.matmul %264, %249, %cst_103 {dimension_numbers = #tpu.dot_dimension_numbers<[1], [0], [0], [1], [0, 0, 1, 1], [], []>} : vector<8x8xf32>, vector<8x8xf32>, vector<8x8xf32> -> vector<8x8xf32>
    %c0_104 = arith.constant 0 : index
    %c16_105 = arith.constant 16 : index
    %266 = vector.load %arg6[%c0_104, %c16_105] : memref<8x32xf32, #tpu.memory_space<vmem>>, vector<8x8xf32>
    tpu.vector_store %arg6[%c0_104, %c16_105], %265 {strides = array<i32>} : memref<8x32xf32, #tpu.memory_space<vmem>>, vector<8x8xf32>,
    %267 = vector.extract_strided_slice %206 {offsets = [0, 24], sizes = [8, 8], strides = [1, 1]} : vector<8x96xf32> to vector<8x8xf32>
    %268 = vector.extract_strided_slice %206 {offsets = [0, 56], sizes = [8, 8], strides = [1, 1]} : vector<8x96xf32> to vector<8x8xf32>
    %269 = vector.extract_strided_slice %206 {offsets = [0, 88], sizes = [8, 8], strides = [1, 1]} : vector<8x96xf32> to vector<8x8xf32>
    %cst_106 = arith.constant dense<0.000000e+00> : vector<8x8xf32>
    %270 = tpu.matmul %267, %268, %cst_106 {dimension_numbers = #tpu.dot_dimension_numbers<[1], [1], [0], [0], [0, 0, 1, 0], [], []>} : vector<8x8xf32>, vector<8x8xf32>, vector<8x8xf32> -> vector<8x8xf32>
    %cst_107 = arith.constant 0.353553385 : f32
    %271 = vector.broadcast %cst_107 : f32 to vector<8x8xf32>
    %272 = arith.mulf %270, %271 : vector<8x8xf32>
    %273 = vector.broadcast %3 : vector<1x8xf32> to vector<8x8xf32>
    %274 = arith.addf %272, %273 : vector<8x8xf32>
    %cst_108 = arith.constant dense<0xFF800000> : vector<8xf32>
    %275 = vector.multi_reduction <maximumf>, %274, %cst_108 [1] : vector<8x8xf32> to vector<8xf32>
    %276 = vector.shape_cast %275 : vector<8xf32> to vector<8x1xf32>
    %277 = vector.broadcast %276 : vector<8x1xf32> to vector<8x8xf32>
    %278 = arith.subf %274, %277 : vector<8x8xf32>
    %279 = math.exp %278 : vector<8x8xf32>
    %cst_109 = arith.constant dense<0.000000e+00> : vector<8xf32>
    %280 = vector.multi_reduction <add>, %279, %cst_109 [1] : vector<8x8xf32> to vector<8xf32>
    %281 = vector.shape_cast %280 : vector<8xf32> to vector<8x1xf32>
    %282 = tpu.reciprocal %281 : vector<8x1xf32> -> vector<8x1xf32>
    %283 = vector.broadcast %282 : vector<8x1xf32> to vector<8x8xf32>
    %284 = arith.mulf %279, %283 : vector<8x8xf32>
    %cst_110 = arith.constant dense<0.000000e+00> : vector<8x8xf32>
    %285 = tpu.matmul %284, %269, %cst_110 {dimension_numbers = #tpu.dot_dimension_numbers<[1], [0], [0], [1], [0, 0, 1, 1], [], []>} : vector<8x8xf32>, vector<8x8xf32>, vector<8x8xf32> -> vector<8x8xf32>
    %c0_111 = arith.constant 0 : index
    %c24_112 = arith.constant 24 : index
    %286 = vector.load %arg6[%c0_111, %c24_112] : memref<8x32xf32, #tpu.memory_space<vmem>>, vector<8x8xf32>
    tpu.vector_store %arg6[%c0_111, %c24_112], %285 {strides = array<i32>} : memref<8x32xf32, #tpu.memory_space<vmem>>, vector<8x8xf32>,
    %c0_113 = arith.constant 0 : index
    %c0_114 = arith.constant 0 : index
    %287 = vector.load %arg6[%c0_113, %c0_114] : memref<8x32xf32, #tpu.memory_space<vmem>>, vector<8x32xf32>
    %cst_115 = arith.constant dense<0.000000e+00> : vector<8x32xf32>
    %288 = tpu.matmul %287, %193, %cst_115 {dimension_numbers = #tpu.dot_dimension_numbers<[1], [0], [0], [1], [0, 0, 1, 1], [], []>} : vector<8x32xf32>, vector<32x32xf32>, vector<8x32xf32> -> vector<8x32xf32>
    %289 = vector.broadcast %197 : vector<1x32xf32> to vector<8x32xf32>
    %290 = arith.addf %288, %289 : vector<8x32xf32>
    %291 = arith.addf %191, %290 : vector<8x32xf32>
    %cst_116 = arith.constant dense<0.000000e+00> : vector<8xf32>
    %292 = vector.multi_reduction <add>, %291, %cst_116 [1] : vector<8x32xf32> to vector<8xf32>
    %293 = vector.shape_cast %292 : vector<8xf32> to vector<8x1xf32>
    %cst_117 = arith.constant 3.200000e+01 : f32
    %294 = vector.broadcast %cst_117 : f32 to vector<8x1xf32>
    %295 = arith.divf %293, %294 : vector<8x1xf32>
    %296 = vector.broadcast %295 : vector<8x1xf32> to vector<8x32xf32>
    %297 = arith.subf %291, %296 : vector<8x32xf32>
    %298 = arith.mulf %297, %297 : vector<8x32xf32>
    %cst_118 = arith.constant dense<0.000000e+00> : vector<8xf32>
    %299 = vector.multi_reduction <add>, %298, %cst_118 [1] : vector<8x32xf32> to vector<8xf32>
    %300 = vector.shape_cast %299 : vector<8xf32> to vector<8x1xf32>
    %cst_119 = arith.constant 3.200000e+01 : f32
    %301 = vector.broadcast %cst_119 : f32 to vector<8x1xf32>
    %302 = arith.divf %300, %301 : vector<8x1xf32>
    %303 = vector.broadcast %295 : vector<8x1xf32> to vector<8x32xf32>
    %304 = arith.subf %291, %303 : vector<8x32xf32>
    %cst_120 = arith.constant 9.99999996E-13 : f32
    %305 = vector.broadcast %cst_120 : f32 to vector<8x1xf32>
    %306 = arith.addf %302, %305 : vector<8x1xf32>
    %307 = math.rsqrt %306 : vector<8x1xf32>
    %308 = vector.broadcast %307 : vector<8x1xf32> to vector<8x32xf32>
    %309 = arith.mulf %304, %308 : vector<8x32xf32>
    %310 = vector.broadcast %198 : vector<1x32xf32> to vector<8x32xf32>
    %311 = arith.mulf %309, %310 : vector<8x32xf32>
    %312 = vector.broadcast %199 : vector<1x32xf32> to vector<8x32xf32>
    %313 = arith.addf %311, %312 : vector<8x32xf32>
    %cst_121 = arith.constant dense<0.000000e+00> : vector<8x64xf32>
    %314 = tpu.matmul %313, %194, %cst_121 {dimension_numbers = #tpu.dot_dimension_numbers<[1], [0], [0], [1], [0, 0, 1, 1], [], []>} : vector<8x32xf32>, vector<32x64xf32>, vector<8x64xf32> -> vector<8x64xf32>
    %315 = vector.broadcast %200 : vector<1x64xf32> to vector<8x64xf32>
    %316 = arith.addf %314, %315 : vector<8x64xf32>
    %cst_122 = arith.constant 5.000000e-01 : f32
    %317 = vector.broadcast %cst_122 : f32 to vector<8x64xf32>
    %318 = arith.mulf %317, %316 : vector<8x64xf32>
    %cst_123 = arith.constant 4.471500e-02 : f32
    %319 = vector.broadcast %cst_123 : f32 to vector<8x64xf32>
    %320 = arith.mulf %319, %316 : vector<8x64xf32>
    %321 = arith.mulf %320, %316 : vector<8x64xf32>
    %322 = arith.mulf %321, %316 : vector<8x64xf32>
    %323 = arith.addf %316, %322 : vector<8x64xf32>
    %cst_124 = arith.constant 0.797884583 : f32
    %324 = vector.broadcast %cst_124 : f32 to vector<8x64xf32>
    %325 = arith.mulf %324, %323 : vector<8x64xf32>
    %326 = math.tanh %325 : vector<8x64xf32>
    %cst_125 = arith.constant 1.000000e+00 : f32
    %327 = vector.broadcast %cst_125 : f32 to vector<8x64xf32>
    %328 = arith.addf %327, %326 : vector<8x64xf32>
    %329 = arith.mulf %318, %328 : vector<8x64xf32>
    %cst_126 = arith.constant dense<0.000000e+00> : vector<8x32xf32>
    %330 = tpu.matmul %329, %195, %cst_126 {dimension_numbers = #tpu.dot_dimension_numbers<[1], [0], [0], [1], [0, 0, 1, 1], [], []>} : vector<8x64xf32>, vector<64x32xf32>, vector<8x32xf32> -> vector<8x32xf32>
    %331 = vector.broadcast %201 : vector<1x32xf32> to vector<8x32xf32>
    %332 = arith.addf %330, %331 : vector<8x32xf32>
    %333 = arith.addf %313, %332 : vector<8x32xf32>
    %cst_127 = arith.constant dense<0.000000e+00> : vector<8xf32>
    %334 = vector.multi_reduction <add>, %333, %cst_127 [1] : vector<8x32xf32> to vector<8xf32>
    %335 = vector.shape_cast %334 : vector<8xf32> to vector<8x1xf32>
    %cst_128 = arith.constant 3.200000e+01 : f32
    %336 = vector.broadcast %cst_128 : f32 to vector<8x1xf32>
    %337 = arith.divf %335, %336 : vector<8x1xf32>
    %338 = vector.broadcast %337 : vector<8x1xf32> to vector<8x32xf32>
    %339 = arith.subf %333, %338 : vector<8x32xf32>
    %340 = arith.mulf %339, %339 : vector<8x32xf32>
    %cst_129 = arith.constant dense<0.000000e+00> : vector<8xf32>
    %341 = vector.multi_reduction <add>, %340, %cst_129 [1] : vector<8x32xf32> to vector<8xf32>
    %342 = vector.shape_cast %341 : vector<8xf32> to vector<8x1xf32>
    %cst_130 = arith.constant 3.200000e+01 : f32
    %343 = vector.broadcast %cst_130 : f32 to vector<8x1xf32>
    %344 = arith.divf %342, %343 : vector<8x1xf32>
    %345 = vector.broadcast %337 : vector<8x1xf32> to vector<8x32xf32>
    %346 = arith.subf %333, %345 : vector<8x32xf32>
    %cst_131 = arith.constant 9.99999996E-13 : f32
    %347 = vector.broadcast %cst_131 : f32 to vector<8x1xf32>
    %348 = arith.addf %344, %347 : vector<8x1xf32>
    %349 = math.rsqrt %348 : vector<8x1xf32>
    %350 = vector.broadcast %349 : vector<8x1xf32> to vector<8x32xf32>
    %351 = arith.mulf %346, %350 : vector<8x32xf32>
    %352 = vector.broadcast %202 : vector<1x32xf32> to vector<8x32xf32>
    %353 = arith.mulf %351, %352 : vector<8x32xf32>
    %354 = vector.broadcast %203 : vector<1x32xf32> to vector<8x32xf32>
    %355 = arith.addf %353, %354 : vector<8x32xf32>
    %c320 = arith.constant 320 : index
    %c0_132 = arith.constant 0 : index
    %356 = vector.load %arg3[%c320, %c0_132] : memref<384x128xf32, #tpu.memory_space<vmem>>, vector<32x32xf32>
    %c352 = arith.constant 352 : index
    %c0_133 = arith.constant 0 : index
    %357 = vector.load %arg3[%c352, %c0_133] : memref<384x128xf32, #tpu.memory_space<vmem>>, vector<32x128xf32>
    %c18 = arith.constant 18 : index
    %c0_134 = arith.constant 0 : index
    %358 = vector.load %arg4[%c18, %c0_134] : memref<24x128xf32, #tpu.memory_space<vmem>>, vector<1x32xf32>
    %c19 = arith.constant 19 : index
    %c0_135 = arith.constant 0 : index
    %359 = vector.load %arg4[%c19, %c0_135] : memref<24x128xf32, #tpu.memory_space<vmem>>, vector<1x128xf32>
    %360 = vector.extract_strided_slice %355 {offsets = [0, 0], sizes = [1, 32], strides = [1, 1]} : vector<8x32xf32> to vector<1x32xf32>
    %cst_136 = arith.constant dense<0.000000e+00> : vector<1x32xf32>
    %361 = tpu.matmul %360, %356, %cst_136 {dimension_numbers = #tpu.dot_dimension_numbers<[1], [0], [0], [1], [0, 0, 1, 1], [], []>} : vector<1x32xf32>, vector<32x32xf32>, vector<1x32xf32> -> vector<1x32xf32>
    %362 = arith.addf %361, %358 : vector<1x32xf32>
    %363 = math.tanh %362 : vector<1x32xf32>
    %cst_137 = arith.constant dense<0.000000e+00> : vector<1x128xf32>
    %364 = tpu.matmul %363, %357, %cst_137 {dimension_numbers = #tpu.dot_dimension_numbers<[1], [0], [0], [1], [0, 0, 1, 1], [], []>} : vector<1x32xf32>, vector<32x128xf32>, vector<1x128xf32> -> vector<1x128xf32>
    %365 = arith.addf %364, %359 : vector<1x128xf32>
    %c0_138 = arith.constant 0 : index
    %c0_139 = arith.constant 0 : index
    %c0_140 = arith.constant 0 : index
    %366 = vector.load %arg5[%c0_138, %c0_139, %c0_140] : memref<1x1x128xf32, #tpu.memory_space<vmem>>, vector<1x1x128xf32>
    %367 = vector.shape_cast %366 : vector<1x1x128xf32> to vector<1x128xf32>
    %368 = vector.shape_cast %365 : vector<1x128xf32> to vector<1x1x128xf32>
    tpu.vector_store %arg5[%c0_138, %c0_139, %c0_140], %368 {strides = array<i32>} : memref<1x1x128xf32, #tpu.memory_space<vmem>>, vector<1x1x128xf32>,
    return
  }
  func.func @transform_0(%arg0: i32) -> (i32, i32, i32) {
    %c0_i32 = arith.constant 0 : i32
    %c0_i32_0 = arith.constant 0 : i32
    %c0_i32_1 = arith.constant 0 : i32
    return %arg0, %c0_i32, %c0_i32_0 : i32, i32, i32
  }
  func.func @transform_1(%arg0: i32) -> (i32, i32, i32) {
    %c0_i32 = arith.constant 0 : i32
    %c0_i32_0 = arith.constant 0 : i32
    %c0_i32_1 = arith.constant 0 : i32
    return %arg0, %c0_i32, %c0_i32_0 : i32, i32, i32
  }
  func.func @transform_2(%arg0: i32) -> (i32, i32) {
    %c0_i32 = arith.constant 0 : i32
    %c0_i32_0 = arith.constant 0 : i32
    %c0_i32_1 = arith.constant 0 : i32
    return %c0_i32, %c0_i32_0 : i32, i32
  }
  func.func @transform_3(%arg0: i32) -> (i32, i32) {
    %c0_i32 = arith.constant 0 : i32
    %c0_i32_0 = arith.constant 0 : i32
    %c0_i32_1 = arith.constant 0 : i32
    return %c0_i32, %c0_i32_0 : i32, i32
  }
  func.func @transform_4(%arg0: i32) -> (i32, i32, i32) {
    %c0_i32 = arith.constant 0 : i32
    %c0_i32_0 = arith.constant 0 : i32
    %c0_i32_1 = arith.constant 0 : i32
    return %arg0, %c0_i32, %c0_i32_0 : i32, i32, i32
  }
}

</mosaic_0001>

<bundles_post_ra>
// kernel: entity_sentiment_forward.1
= control target key start
LH: loop header
LB: loop body
LE: loop exit
PB: predicated region body
PF: predicated region fallthrough
CT: control target
= control target key end

     0   :  { %9 = vsyncpa [#allocation4], 0  ;;  %s3820_s0 = inlined_call_operand.vmem [shape: f32[2,8,32], index: 0, kind: input, shape index: {}]   ;;  %s3821_s1 = inlined_call_operand.vmem [shape: f32[2,1,8], index: 1, kind: input, shape index: {}]   ;;  %s3822_s2 = inlined_call_operand.vmem [shape: f32[384,128], index: 2, kind: input, shape index: {}]   ;;  %s3823_s3 = inlined_call_operand.vmem [shape: f32[24,128], index: 3, kind: input, shape index: {}]   ;;  %s3824_s4 = inlined_call_operand.hbm [shape: f32[2,1,128], index: 4, kind: output, shape index: {}]  }
   0x1   :  { %11 = vsyncpa [#allocation4 + $0x1], 0  ;;  %s3275_s15 = smov 0   ;;  %s3277_s16 = smov 0  }
   0x2   :  { %s3279_s17 = smov 0   ;;  %s3281_s18 = smov 0  }
   0x3 LB: > { %s3296_s19 = sadd.s32 4294967295, %s3230_s18   ;;  %s2635_s20 = sadd.s32 4294967294, %s3230_s18   ;;  %s3230_s18 = sphi %s3281_s18, %s3842_s18   ;;  %s3226_s17 = sphi %s3279_s17, %s3841_s17   ;;  %s3222_s16 = sphi %s3277_s16, %s3840_s16   ;;  %s3218_s15 = sphi %s3275_s15, %s3839_s15  }
   0x4   : > { %s3300_s21 = sadd.s32 1, %s3230_s18   ;;  %s118_s22 = sadd.s32 1, %s3226_s17 }
   0x5   : > { %s115_s23 = ssub.s32 %s3230_s18, %s3300_s21  ;;  %p128_p0 = scmp.ne.s32.totalorder %s3226_s17, %s3222_s16 }
   0x6   : > { %p116_p1 = scmp.eq.s32.totalorder %s115_s23, 0  ;;  %p129_p2 = scmp.eq.s32.totalorder %s3296_s19, 1 }
   0x7   : > { %p134_p3 = scmp.ne.s32.totalorder %s3222_s16, %s3218_s15  ;;  %p135_p4 = scmp.eq.s32.totalorder %s2635_s20, 1 }
   0x8   : > { %s3311_s24 = scalar_select %p116_p1, %s3226_s17, %s118_s22  }
   0x9   : > { %p3313_p5 = por %p129_p2, %p128_p0  ;;  %p3317_p6 = por %p135_p4, %p134_p3 }
   0xa   : > { %p2638_p7 = scmp.ge.s32.totalorder %s3230_s18, 1  ;;  %p172_p8 = scmp.lt.s32.totalorder %s3230_s18, 3 }
   0xc   : > { %p173_p9 = pnand %p2638_p7, %p172_p8 }
   0xd   : > { %p199_p10 = scmp.lt.s32.totalorder (!%p173_p9), %s3296_s19, 1  ;;  %vm210_vm0 = vcmask (!%p173_p9), 261120   ;;  %v235_v7 = vld [vmem:[%s3822_s2] sm:$0xff] (!%p173_p9)  ;;  %v236_v8 = vld [vmem:[%s3822_s2 + $0x8] sm:$0xff] (!%p173_p9)  ;;  %v237_v9 = vld [vmem:[%s3822_s2 + $0x10] sm:$0xff] (!%p173_p9)  ;;  %v3232_v10 = vmov (!%p173_p9), 0.0|0.0  }
   0xe   : > { %176 = sbr.rel (%p173_p9) target bundleno = 5809 (0x16b1), region = 36  ;;  %2992 = vmatprep.subr.bf16.mxu0 (!%p173_p9), %v3232_v10  ;;  %v2993_v11 = vpack.c.bf16 (!%p173_p9), %v236_v8, %v235_v7  ;;  %v238_v12 = vld [vmem:[%s3822_s2 + $0x18] sm:$0xff] (!%p173_p9)  ;;  %vm3233_vm1 = vmmov (!%p173_p9), 0   ;;  %v3234_v13 = vmov (!%p173_p9), 0.0   ;;  %v2640_v19 = vld [vmem:[%s3823_s3] ss:$0 sm:$0xff] (!%p173_p9) }
   0xf   : > { %2794 = vmatprep.mubr.msk.f32.mxu0 (!%p173_p9), %vm3233_vm1, %v3234_v13  ;;  %2797 = vmatprep.subr.mxu1 (!%p173_p9), %v3234_v13  ;;  %v2996_v14 = vpack.c.bf16 (!%p173_p9), %v238_v12, %v237_v9  ;;  %v2641_v21 = vld [vmem:[%s3823_s3 + $0x1] ss:$0 sm:$0xff] (!%p173_p9)  ;;  %v2642_v24 = vld [vmem:[%s3823_s3 + $0x2] ss:$0 sm:$0xff] (!%p173_p9)  ;;  %s3235_s30 = smov (!%p173_p9), 120   ;;  %s3237_s6 = smov (!%p173_p9), 88  }
  0x10   : > { %2799 = vmatprep.mubr.msk.f32.mxu1 (!%p173_p9), %vm3233_vm1, %v3234_v13  ;;  %2994 = vmatpush3.bf16.msra.mxu0 (!%p173_p9), %v2993_v11  ;;  %s3238_s7 = smov (!%p173_p9), 80   ;;  %s3239_s8 = smov (!%p173_p9), 112   ;;  %vm343_vm2 = vcmask (!%p173_p9), 64512   ;;  %vm685_vm3 = vcmask (!%p173_p9), 130112   ;;  %vm858_vm4 = vcmask (!%p173_p9), 195712   ;;  %vm1031_vm5 = vcmask (!%p173_p9), 261312  }
  0x11   : > { %2995 = vmatprep.subr.bf16.mxu0 (!%p173_p9), %v3232_v10  ;;  %s3240_s9 = smov (!%p173_p9), 72   ;;  %s3241_s10 = smov (!%p173_p9), 104   ;;  %vm1225_vm6 = vcmask (!%p173_p9), 523264  }
  0x12   : > { %s3830_s14 = smov (!%p173_p9), 48   ;;  %s3826_s20 = smov (!%p173_p9), 40  }
  0x13   : > { %s3825_s22 = smov (!%p173_p9), 56   ;;  %s3829_s23 = smov (!%p173_p9), 8  }
  0x14   : > { %2997 = vmatpush3.bf16.msra.mxu0 (!%p173_p9), %v2996_v14  ;;  %s3838_s29 = smov (!%p173_p9), 24  }
  0x15   : > { %s3325_s27 = scalar_select %p199_p10, %s3296_s19, 1  ;;  %2807 = vmatprep.subr.mxu0 %v3234_v13 }
  0x17   : > { %s2639_s28 = sshll.u32 %s3325_s27, 3  ;;  %s205_s13 = scalar_lea.vmem %s3821_s1, %s3325_s27 }
  0x18   : > { %s202_s5 = scalar_lea.vmem %s3820_s0, %s2639_s28  ;;  %v3409_v35 = vld [vmem:[%s205_s13] ss:$0 sm:$0xff]  ;;  %s3242_s27 = smov 64  }
  0x19   : > { %v206_v0 = vld [vmem:[%s202_s5] sm:$0xff]  ;;  %s3236_s5 = smov 96   ;;  %s3828_s28 = smov 16  }
  0x1a   : > { %v211_v1 = vsel %vm210_vm0, %v206_v0, 0.0 }
  0x1b   : > { %212 = vadd.xlane.f32.xlu0 %v211_v1 }
  0xa8   : > { %v213_v2 = vpop.xlane.xlu0 %212 }
  0xa9   : > { %v215_v3 = vmul.f32 0.03125, %v213_v2 }
  0xab   : > { %v216_v4 = vsub.f32 %v206_v0, %v215_v3 }
  0xad   : > { %v217_v5 = vmul.f32 %v216_v4, %v216_v4 }
  0xaf   : > { %v218_v6 = vsel %vm210_vm0, %v217_v5, 0.0 }
  0xb0   : > { %219 = vadd.xlane.f32.xlu0 %v218_v6 }
 0x13d   : > { %v220_v15 = vpop.xlane.xlu0 %219 }
 0x13e   : > { %v221_v16 = vmul.f32 0.03125, %v220_v15 }
 0x140   : > { %v222_v17 = vadd.f32 1e-12, %v221_v16 }
 0x142   : > { %3120 = vrsqrt.f32 %v222_v17 }
 0x14c   : > { %v3121_v18 = vpop.eup %3120 }
 0x14d   : > { %v224_v20 = vmul.f32 %v3121_v18, %v216_v4 }
 0x14f   : > { %v229_v22 = vmul.f32 %v2640_v19, %v224_v20 }
 0x151   : > { %v3359_v23 = vadd.f32 %v2641_v21, %v229_v22 }
 0x153   : > { %2795 = vmatmul.mubr.msk.f32.vlgmr.msra.gmra.mrb[0].mxu0 %vm210_vm0, %v3359_v23 }
 0x154   : > { %2809 = vmatprep.mubr.msk.f32.mxu0 %vm3233_vm1, %v3234_v13 }
 0x226   : > { %v336_v25 = vpop.f32.mrb[0].mxu0 }
 0x227   : > { %v3368_v26 = vadd.f32 %v2642_v24, %v336_v25  ;;  %v2796_v27 = vpop.f32.mrb[1].mxu0 }
 0x229   : > { %514 = vrot.lane.b32.xlu0 %v3368_v26, %s3235_s30  ;;  %341 = vrot.lane.b32.xlu1 %v3368_v26, %s3236_s5 }
 0x22d   : > { %516 = vrot.lane.b32.xlu1 %v3368_v26, %s3237_s6 }
 0x231   : > { %689 = vrot.lane.b32.xlu1 %v3368_v26, %s3238_s7 }
 0x235   : > { %687 = vrot.lane.b32.xlu1 %v3368_v26, %s3239_s8 }
 0x239   : > { %862 = vrot.lane.b32.xlu1 %v3368_v26, %s3240_s9 }
 0x23d   : > { %860 = vrot.lane.b32.xlu1 %v3368_v26, %s3241_s10 }
 0x29b   : > { %v342_v28 = vpop.permute.xlu1 %341  ;;  %v515_v30 = vpop.permute.xlu0 %514 }
 0x29c   : > { %2798 = vmatpush3.xpose.msk.msra.mxu1 %vm343_vm2, %v342_v28 }
 0x29d   : > { %2802 = vmatprep.subr.mxu1 %v3234_v13 }
 0x29f   : > { %2800 = vmatmul.mubr.msk.f32.vlgmr.msra.gmra.mrb[0].mxu1 %vm343_vm2, %v3368_v26  ;;  %v517_v29 = vpop.permute.xlu1 %516 }
 0x2a0   : > { %2808 = vmatpush3.xpose.msk.msra.mxu0 %vm343_vm2, %v517_v29  ;;  %2804 = vmatprep.mubr.msk.f32.mxu1 %vm3233_vm1, %v3234_v13 }
 0x2a1   : > { %2817 = vmatprep.subr.mxu0 %v3234_v13 }
 0x2a3   : > { %2810 = vmatmul.mubr.msk.f32.vlgmr.msra.gmra.mrb[2].mxu0 %vm343_vm2, %v515_v30  ;;  %v690_v31 = vpop.permute.xlu1 %689 }
 0x2a4   : > { %2818 = vmatpush3.xpose.msk.msra.mxu0 %vm343_vm2, %v690_v31  ;;  %2819 = vmatprep.mubr.msk.f32.mxu0 %vm3233_vm1, %v3234_v13 }
 0x2a5   : > { %2827 = vmatprep.subr.mxu0 %v3234_v13 }
 0x2a7   : > { %v688_v32 = vpop.permute.xlu1 %687 }
 0x2a8   : > { %2820 = vmatmul.mubr.msk.f32.vlgmr.msra.gmra.mrb[4].mxu0 %vm343_vm2, %v688_v32 }
 0x2a9   : > { %2829 = vmatprep.mubr.msk.f32.mxu0 %vm3233_vm1, %v3234_v13 }
 0x2ab   : > { %v863_v33 = vpop.permute.xlu1 %862 }
 0x2ac   : > { %2828 = vmatpush3.xpose.msk.msra.mxu0 %vm343_vm2, %v863_v33  ;;  %v239_v33 = vld [vmem:[%s3822_s2 + $0x20] sm:$0xff] }
 0x2ad   : > { %2998 = vmatprep.subr.bf16.mxu0 %v3232_v10 }
 0x2af   : > { %v861_v34 = vpop.permute.xlu1 %860 }
 0x2b0   : > { %2830 = vmatmul.mubr.msk.f32.vlgmr.msra.gmra.mrb[6].mxu0 %vm343_vm2, %v861_v34  ;;  %v240_v34 = vld [vmem:[%s3822_s2 + $0x28] sm:$0xff] }
 0x2b1   : > { %2845 = vmatprep.mubr.msk.f32.mxu0 %vm3233_vm1, %v3234_v13 }
 0x372   : > { %v414_v36 = vpop.f32.mrb[0].mxu1 }
 0x373   : > { %v418_v37 = vmul.f32 0.35355338, %v414_v36  ;;  %v2801_v38 = vpop.f32.mrb[1].mxu1  ;;  %v2999_v36 = vpack.c.bf16 %v240_v34, %v239_v33 }
 0x374   : > { %v242_v38 = vld [vmem:[%s3822_s2 + $0x38] sm:$0xff] }
 0x375   : > { %v425_v39 = vadd.f32 %v3409_v35, %v418_v37  ;;  %v241_v37 = vld [vmem:[%s3822_s2 + $0x30] sm:$0xff]  ;;  %3000 = vmatpush3.bf16.msra.mxu0 %v2999_v36 }
 0x376   : > { %v588_v40 = vpop.f32.mrb[2].mxu0  ;;  %3001 = vmatprep.subr.bf16.mxu0 %v3232_v10 }
 0x377   : > { %v592_v41 = vmul.f32 0.35355338, %v588_v40  ;;  %v2811_v42 = vpop.f32.mrb[3].mxu0  ;;  %v426_v43 = vsel %vm343_vm2, %v425_v39, -inf }
 0x378   : > { %427 = vmax.xlane.f32.xlu1 %v426_v43 }
 0x379   : > { %v593_v44 = vadd.f32 %v3409_v35, %v592_v41 }
 0x37b   : > { %v761_v45 = vpop.f32.mrb[4].mxu0  ;;  %v594_v46 = vsel %vm343_vm2, %v593_v44, -inf }
 0x37c   : > { %v765_v47 = vmul.f32 0.35355338, %v761_v45  ;;  %595 = vmax.xlane.f32.xlu0 %v594_v46  ;;  %v2821_v48 = vpop.f32.mrb[5].mxu0 }
 0x37e   : > { %v766_v49 = vadd.f32 %v3409_v35, %v765_v47 }
 0x380   : > { %v767_v50 = vsel %vm343_vm2, %v766_v49, -inf }
 0x381   : > { %768 = vmax.xlane.f32.xlu1 %v767_v50  ;;  %v2657_v50 = vld [vmem:[%s3823_s3 + $0x3] ss:$0 sm:$0xff] }
 0x383   : > { %v934_v51 = vpop.f32.mrb[6].mxu0 }
 0x384   : > { %v938_v52 = vmul.f32 0.35355338, %v934_v51  ;;  %v2831_v53 = vpop.f32.mrb[7].mxu0 }
 0x386   : > { %v939_v54 = vadd.f32 %v3409_v35, %v938_v52 }
 0x388   : > { %v940_v55 = vsel %vm343_vm2, %v939_v54, -inf }
 0x389   : > { %941 = vmax.xlane.f32.xlu0 %v940_v55 }
 0x392   : > { %437 = vrot.lane.b32.xlu1 %v3368_v26, %s3242_s27 }
 0x405   : > { %v428_v56 = vpop.xlane.xlu1 %427 }
 0x406   : > { %v429_v57 = vsub.f32 %v425_v39, %v428_v56  ;;  %v3002_v39 = vpack.c.bf16 %v242_v38, %v241_v37 }
 0x408   : > { %v430_v58 = vmul.f32 1.442695, %v429_v57  ;;  %3003 = vmatpush3.bf16.msra.mxu0 %v3002_v39 }
 0x409   : > { %v596_v59 = vpop.xlane.xlu0 %595  ;;  %3010 = vmatprep.subr.bf16.mxu0 %v3232_v10 }
 0x40a   : > { %3122 = vpow2.f32 %v430_v58  ;;  %v597_v60 = vsub.f32 %v593_v44, %v596_v59 }
 0x40c   : > { %v598_v61 = vmul.f32 1.442695, %v597_v60 }
 0x40e   : > { %3124 = vpow2.f32 %v598_v61  ;;  %v769_v62 = vpop.xlane.xlu1 %768  ;;  %v243_v61 = vld [vmem:[%s3822_s2 + $0x40] sm:$0xff] }
 0x40f   : > { %v770_v63 = vsub.f32 %v766_v49, %v769_v62  ;;  %v244_v62 = vld [vmem:[%s3822_s2 + $0x48] sm:$0xff] }
 0x411   : > { %v771_v0 = vmul.f32 1.442695, %v770_v63  ;;  %v3005_v63 = vpack.c.bf16 %v244_v62, %v243_v61  ;;  %v2665_v61 = vld [vmem:[%s3823_s3 + $0x8] ss:$0 sm:$0xff] }
 0x412   : > { %v438_v1 = vpop.permute.xlu1 %437 }
 0x413   : > { %3126 = vpow2.f32 %v771_v0  ;;  %2803 = vmatpush3.msra.mxu1 %v438_v1  ;;  %v246_v0 = vld [vmem:[%s3822_s2 + $0x58] sm:$0xff] }
 0x414   : > { %v3123_v2 = vpop.eup %3122  ;;  %2812 = vmatprep.subr.mxu1 %v3234_v13 }
 0x415   : > { %v432_v3 = vsel %vm343_vm2, %v3123_v2, 0.0 }
 0x416   : > { %433 = vadd.xlane.f32.xlu1 %v432_v3  ;;  %v942_v4 = vpop.xlane.xlu0 %941 }
 0x417   : > { %v943_v5 = vsub.f32 %v939_v54, %v942_v4 }
 0x418   : > { %v3125_v6 = vpop.eup %3124 }
 0x419   : > { %v944_v7 = vmul.f32 1.442695, %v943_v5  ;;  %v600_v8 = vsel %vm343_vm2, %v3125_v6, 0.0 }
 0x41a   : > { %601 = vadd.xlane.f32.xlu0 %v600_v8  ;;  %v2660_v8 = vld [vmem:[%s3823_s3 + $0x5] ss:$0 sm:$0xff] }
 0x41b   : > { %3128 = vpow2.f32 %v944_v7 }
 0x41d   : > { %v3127_v9 = vpop.eup %3126 }
 0x41e   : > { %v773_v11 = vsel %vm343_vm2, %v3127_v9, 0.0 }
 0x41f   : > { %774 = vadd.xlane.f32.xlu1 %v773_v11 }
 0x425   : > { %v3129_v12 = vpop.eup %3128 }
 0x426   : > { %v946_v14 = vsel %vm343_vm2, %v3129_v12, 0.0 }
 0x427   : > { %947 = vadd.xlane.f32.xlu0 %v946_v14  ;;  %v248_v14 = vld [vmem:[%s3822_s2 + $0x68] sm:$0xff] }
 0x430   : > { %778 = vrot.lane.b32.xlu1 %v3368_v26, %s3830_s14 }
 0x434   : > { %951 = vrot.lane.b32.xlu1 %v3368_v26, %s3826_s20  ;;  %s3827_s20 = smov 24  }
 0x43d   : > { %605 = vrot.lane.b32.xlu0 %v3368_v26, %s3825_s22  ;;  %s3837_s22 = smov 16  }
 0x4a3   : > { %v434_v15 = vpop.xlane.xlu1 %433 }
 0x4a4   : > { %3130 = vrcp.f32 %v434_v15 }
 0x4a7   : > { %v602_v16 = vpop.xlane.xlu0 %601 }
 0x4a8   : > { %3132 = vrcp.f32 %v602_v16  ;;  %v249_v16 = vld [vmem:[%s3822_s2 + $0x70] sm:$0xff] }
 0x4ac   : > { %v775_v17 = vpop.xlane.xlu1 %774 }
 0x4ad   : > { %3134 = vrcp.f32 %v775_v17  ;;  %v250_v17 = vld [vmem:[%s3822_s2 + $0x78] sm:$0xff] }
 0x4ae   : > { %v3131_v18 = vpop.eup %3130 }
 0x4af   : > { %v436_v19 = vmul.f32 %v3131_v18, %v3123_v2  ;;  %v3014_v18 = vpack.c.bf16 %v250_v17, %v249_v16 }
 0x4b0   : > { %v779_v24 = vpop.permute.xlu1 %778 }
 0x4b1   : > { %2805 = vmatmul.mubr.msk.f32.vlgmr.msra.gmra.mrb[2].mxu1 %vm343_vm2, %v436_v19  ;;  %v251_v19 = vld [vmem:[%s3822_s2 + $0x80] sm:$0xff] }
 0x4b2   : > { %2814 = vmatprep.mubr.msk.f32.mxu1 %vm3233_vm1, %v3234_v13  ;;  %v3133_v21 = vpop.eup %3132 }
 0x4b3   : > { %v604_v22 = vmul.f32 %v3133_v21, %v3125_v6  ;;  %v2659_v6 = vld [vmem:[%s3823_s3 + $0x4] ss:$0 sm:$0xff] }
 0x4b4   : > { %v948_v20 = vpop.xlane.xlu0 %947  ;;  %v952_v28 = vpop.permute.xlu1 %951 }
 0x4b5   : > { %3136 = vrcp.f32 %v948_v20  ;;  %v252_v20 = vld [vmem:[%s3822_s2 + $0x88] sm:$0xff] }
 0x4b6   : > { %v3017_v21 = vpack.c.bf16 %v252_v20, %v251_v19 }
 0x4b7   : > { %v3135_v26 = vpop.eup %3134 }
 0x4b8   : > { %v606_v25 = vpop.permute.xlu0 %605  ;;  %v777_v27 = vmul.f32 %v3135_v26, %v3127_v9  ;;  %v2661_v26 = vld [vmem:[%s3823_s3 + $0x6] ss:$0 sm:$0xff] }
 0x4b9   : > { %2813 = vmatpush3.msra.mxu1 %v606_v25 }
 0x4ba   : > { %2815 = vmatmul.mubr.msk.f32.vlgmr.msra.gmra.mrb[4].mxu1 %vm343_vm2, %v604_v22  ;;  %2822 = vmatprep.subr.mxu1 %v3234_v13  ;;  %v253_v22 = vld [vmem:[%s3822_s2 + $0x90] sm:$0xff] }
 0x4bb   : > { %2823 = vmatpush3.msra.mxu1 %v779_v24  ;;  %2824 = vmatprep.mubr.msk.f32.mxu1 %vm3233_vm1, %v3234_v13  ;;  %v254_v24 = vld [vmem:[%s3822_s2 + $0x98] sm:$0xff] }
 0x4bc   : > { %2832 = vmatprep.subr.mxu1 %v3234_v13  ;;  %v3020_v25 = vpack.c.bf16 %v254_v24, %v253_v22 }
 0x4be   : > { %2825 = vmatmul.mubr.msk.f32.vlgmr.msra.gmra.mrb[6].mxu1 %vm343_vm2, %v777_v27 }
 0x4bf   : > { %v3137_v29 = vpop.eup %3136  ;;  %2833 = vmatpush3.msra.mxu1 %v952_v28  ;;  %2834 = vmatprep.mubr.msk.f32.mxu1 %vm3233_vm1, %v3234_v13 }
 0x4c0   : > { %v950_v30 = vmul.f32 %v3137_v29, %v3129_v12  ;;  %3004 = vmatprep.subr.bf16.mxu1 %v3232_v10  ;;  %v247_v12 = vld [vmem:[%s3822_s2 + $0x60] sm:$0xff] }
 0x4c1   : > { %v3011_v15 = vpack.c.bf16 %v248_v14, %v247_v12 }
 0x4c2   : > { %2835 = vmatmul.mubr.msk.f32.vlgmr.msra.gmra.mrb[8].mxu1 %vm343_vm2, %v950_v30 }
 0x4c3   : > { %2856 = vmatprep.mubr.msk.f32.mxu1 %vm3233_vm1, %v3234_v13  ;;  %3006 = vmatpush3.bf16.msra.mxu1 %v3005_v63  ;;  %v2666_v63 = vld [vmem:[%s3823_s3 + $0x9] ss:$0 sm:$0xff] }
 0x4c4   : > { %3007 = vmatprep.subr.bf16.mxu1 %v3232_v10 }
 0x584   : > { %v509_v31 = vpop.f32.mrb[2].mxu1 }
 0x585   : > { %513 = vst.msk [vmem:[#allocation2] sm:$0xff] %vm343_vm2, %v509_v31  ;;  %v2806_v32 = vpop.f32.mrb[3].mxu1 }
 0x58d   : > { %v677_v40 = vpop.f32.mrb[4].mxu1 }
 0x58e   : > { %682 = vrot.lane.b32.xlu0 %v677_v40, %s3829_s23  ;;  %v2816_v41 = vpop.f32.mrb[5].mxu1  ;;  %v2663_v40 = vld [vmem:[%s3823_s3 + $0x7] ss:$0 sm:$0xff] }
 0x591   : > { %v850_v42 = vpop.f32.mrb[6].mxu1 }
 0x592   : > { %855 = vrot.lane.b32.xlu1 %v850_v42, %s3828_s28  ;;  %v2826_v43 = vpop.f32.mrb[7].mxu1  ;;  %s3836_s28 = smov 8  }
 0x595   : > { %v1023_v44 = vpop.f32.mrb[8].mxu1 }
 0x596   : > { %1028 = vrot.lane.b32.xlu0 %v1023_v44, %s3827_s20  ;;  %v2836_v45 = vpop.f32.mrb[9].mxu1 }
 0x600   : > { %v683_v46 = vpop.permute.xlu0 %682 }
 0x601   : > { %686 = vst.msk [vmem:[#allocation2] sm:$0xff] %vm685_vm3, %v683_v46 }
 0x604   : > { %v856_v47 = vpop.permute.xlu1 %855 }
 0x605   : > { %859 = vst.msk [vmem:[#allocation2] sm:$0xff] %vm858_vm4, %v856_v47 }
 0x608   : > { %v1029_v48 = vpop.permute.xlu0 %1028 }
 0x609   : > { %1032 = vst.msk [vmem:[#allocation2] sm:$0xff] %vm1031_vm5, %v1029_v48 }
 0x610   : > { %v1033_v49 = vld [vmem:[#allocation2] sm:$0xff] }
 0x611   : > { %2846 = vmatmul.mubr.msk.f32.vlgmr.msra.gmra.mrb[8].mxu0 %vm210_vm0, %v1033_v49 }
 0x612   : > { %2875 = vmatprep.mubr.msk.f32.mxu0 %vm3233_vm1, %v3234_v13  ;;  %3012 = vmatpush3.bf16.msra.mxu0 %v3011_v15 }
 0x613   : > { %3013 = vmatprep.subr.bf16.mxu0 %v3232_v10 }
 0x616   : > { %3015 = vmatpush3.bf16.msra.mxu0 %v3014_v18 }
 0x617   : > { %3016 = vmatprep.subr.bf16.mxu0 %v3232_v10 }
 0x61a   : > { %3018 = vmatpush3.bf16.msra.mxu0 %v3017_v21 }
 0x61b   : > { %3019 = vmatprep.subr.bf16.mxu0 %v3232_v10 }
 0x61e   : > { %3021 = vmatpush3.bf16.msra.mxu0 %v3020_v25 }
 0x61f   : > { %2899 = vmatprep.subr.mxu0 %v3234_v13 }
 0x6e4   : > { %v1107_v51 = vpop.f32.mrb[8].mxu0 }
 0x6e5   : > { %v1108_v52 = vadd.f32 %v2657_v50, %v1107_v51  ;;  %v2847_v53 = vpop.f32.mrb[9].mxu0  ;;  %v1323_v51 = vld [vmem:[%s3822_s2 + $0xa0] sm:$0xff] }
 0x6e7   : > { %v1111_v54 = vadd.f32 %v1108_v52, %v3359_v23  ;;  %v245_v23 = vld [vmem:[%s3822_s2 + $0x50] sm:$0xff]  ;;  %v1324_v52 = vld [vmem:[%s3822_s2 + $0xa8] sm:$0xff] }
 0x6e8   : > { %v3008_v1 = vpack.c.bf16 %v246_v0, %v245_v23  ;;  %v3023_v53 = vpack.c.bf16 %v1324_v52, %v1323_v51 }
 0x6e9   : > { %v1112_v55 = vsel %vm210_vm0, %v1111_v54, 0.0 }
 0x6ea   : > { %1113 = vadd.xlane.f32.xlu1 %v1112_v55  ;;  %3009 = vmatpush3.bf16.msra.mxu1 %v3008_v1  ;;  %v1326_v55 = vld [vmem:[%s3822_s2 + $0xb8] sm:$0xff]  ;;  %v2667_v1 = vld [vmem:[%s3823_s3 + $0xa] ss:$0 sm:$0xff] }
 0x6eb   : > { %3022 = vmatprep.subr.bf16.mxu1 %v3232_v10 }
 0x777   : > { %v1114_v56 = vpop.xlane.xlu1 %1113 }
 0x778   : > { %v1115_v57 = vmul.f32 0.03125, %v1114_v56 }
 0x77a   : > { %v1116_v58 = vsub.f32 %v1111_v54, %v1115_v57  ;;  %v1325_v54 = vld [vmem:[%s3822_s2 + $0xb0] sm:$0xff] }
 0x77b   : > { %v3026_v56 = vpack.c.bf16 %v1326_v55, %v1325_v54 }
 0x77c   : > { %v1117_v59 = vmul.f32 %v1116_v58, %v1116_v58 }
 0x77e   : > { %v1118_v60 = vsel %vm210_vm0, %v1117_v59, 0.0 }
 0x77f   : > { %1119 = vadd.xlane.f32.xlu0 %v1118_v60 }
 0x80c   : > { %v1120_v2 = vpop.xlane.xlu0 %1119 }
 0x80d   : > { %v1121_v3 = vmul.f32 0.03125, %v1120_v2 }
 0x80f   : > { %v1122_v4 = vadd.f32 1e-12, %v1121_v3 }
 0x811   : > { %3138 = vrsqrt.f32 %v1122_v4 }
 0x81b   : > { %v3139_v5 = vpop.eup %3138 }
 0x81c   : > { %v1124_v7 = vmul.f32 %v3139_v5, %v1116_v58 }
 0x81e   : > { %v1129_v9 = vmul.f32 %v2659_v6, %v1124_v7 }
 0x820   : > { %v1134_v11 = vadd.f32 %v2660_v8, %v1129_v9 }
 0x822   : > { %2857 = vmatmul.mubr.msk.f32.vlgmr.msra.gmra.mrb[10].mxu1 %vm210_vm0, %v1134_v11 }
 0x823   : > { %2886 = vmatprep.mubr.msk.f32.mxu1 %vm3233_vm1, %v3234_v13  ;;  %3024 = vmatpush3.bf16.msra.mxu1 %v3023_v53 }
 0x824   : > { %3025 = vmatprep.subr.bf16.mxu1 %v3232_v10 }
 0x827   : > { %3027 = vmatpush3.bf16.msra.mxu1 %v3026_v56 }
 0x828   : > { %2889 = vmatprep.subr.mxu1 %v3234_v13 }
 0x8f5   : > { %v1208_v27 = vpop.f32.mrb[10].mxu1 }
 0x8f6   : > { %v1209_v28 = vadd.f32 %v2661_v26, %v1208_v27  ;;  %v2858_v29 = vpop.f32.mrb[11].mxu1 }
 0x8f8   : > { %v1213_v30 = vmul.f32 0.044715, %v1209_v28  ;;  %v1212_v37 = vmul.f32 0.5, %v1209_v28 }
 0x8fa   : > { %v1214_v31 = vmul.f32 %v1213_v30, %v1209_v28 }
 0x8fc   : > { %v1215_v32 = vmul.f32 %v1214_v31, %v1209_v28 }
 0x8fe   : > { %v1216_v33 = vadd.f32 %v1215_v32, %v1209_v28 }
 0x900   : > { %v1217_v34 = vmul.f32 0.7978846, %v1216_v33 }
 0x902   : > { %3140 = vtanh.f32 %v1217_v34 }
 0x90c   : > { %v3141_v36 = vpop.eup %3140 }
 0x90d   : > { %v1219_v38 = vadd.f32 1.0, %v3141_v36 }
 0x90f   : > { %v1220_v39 = vmul.f32 %v1219_v38, %v1212_v37 }
 0x911   : > { %2876 = vmatmul.mubr.msk.f32.vlgmr.msra.gmra.mrb[10].mxu0 %vm1225_vm6, %v1220_v39 }
 0x912   : > { %2901 = vmatprep.mubr.msk.f32.mxu0 %vm3233_vm1, %v3234_v13 }
 0x9e4   : > { %v1295_v41 = vpop.f32.mrb[10].mxu0 }
 0x9e5   : > { %v1296_v42 = vadd.f32 %v2663_v40, %v1295_v41  ;;  %v2877_v43 = vpop.f32.mrb[11].mxu0 }
 0x9e7   : > { %v1299_v44 = vadd.f32 %v1296_v42, %v1134_v11 }
 0x9e9   : > { %v1300_v45 = vsel %vm210_vm0, %v1299_v44, 0.0 }
 0x9ea   : > { %1301 = vadd.xlane.f32.xlu0 %v1300_v45 }
 0xa77   : > { %v1302_v46 = vpop.xlane.xlu0 %1301 }
 0xa78   : > { %v1303_v47 = vmul.f32 0.03125, %v1302_v46 }
 0xa7a   : > { %v1304_v48 = vsub.f32 %v1299_v44, %v1303_v47 }
 0xa7c   : > { %v1305_v49 = vmul.f32 %v1304_v48, %v1304_v48 }
 0xa7e   : > { %v1306_v50 = vsel %vm210_vm0, %v1305_v49, 0.0 }
 0xa7f   : > { %1307 = vadd.xlane.f32.xlu1 %v1306_v50 }
 0xb0c   : > { %v1308_v57 = vpop.xlane.xlu1 %1307 }
 0xb0d   : > { %v1309_v58 = vmul.f32 0.03125, %v1308_v57 }
 0xb0f   : > { %v1310_v59 = vadd.f32 1e-12, %v1309_v58 }
 0xb11   : > { %3142 = vrsqrt.f32 %v1310_v59 }
 0xb1b   : > { %v3143_v60 = vpop.eup %3142 }
 0xb1c   : > { %v1312_v62 = vmul.f32 %v3143_v60, %v1304_v48 }
 0xb1e   : > { %v1317_v23 = vmul.f32 %v2665_v61, %v1312_v62 }
 0xb20   : > { %v3559_v0 = vadd.f32 %v2666_v63, %v1317_v23 }
 0xb22   : > { %2887 = vmatmul.mubr.msk.f32.vlgmr.msra.gmra.mrb[12].mxu1 %vm210_vm0, %v3559_v0 }
 0xb23   : > { %2891 = vmatprep.mubr.msk.f32.mxu1 %vm3233_vm1, %v3234_v13 }
 0xbf5   : > { %v1424_v2 = vpop.f32.mrb[12].mxu1 }
 0xbf6   : > { %v3568_v3 = vadd.f32 %v2667_v1, %v1424_v2  ;;  %v2888_v4 = vpop.f32.mrb[13].mxu1 }
 0xbf8   : > { %1597 = vrot.lane.b32.xlu1 %v3568_v3, %s3237_s6  ;;  %1429 = vrot.lane.b32.xlu0 %v3568_v3, %s3236_s5  ;;  %s3834_s5 = smov 40   ;;  %s3835_s6 = smov 56  }
 0xbfc   : > { %1595 = vrot.lane.b32.xlu1 %v3568_v3, %s3235_s30  ;;  %1769 = vrot.lane.b32.xlu0 %v3568_v3, %s3238_s7  ;;  %s3833_s30 = smov 48  }
 0xc00   : > { %1767 = vrot.lane.b32.xlu1 %v3568_v3, %s3239_s8  ;;  %1941 = vrot.lane.b32.xlu0 %v3568_v3, %s3240_s9  ;;  %s2693_s9 = sshll.u32 %s3296_s19, 4  ;;  %s3249_s19 = smov [#allocation3]  }
 0xc01   : > { %s3778_s23 = scalar_lea.hbm %s3824_s4, %s2693_s9 }
 0xc04   : > { %1939 = vrot.lane.b32.xlu1 %v3568_v3, %s3241_s10 }
 0xc6a   : > { %v1598_v5 = vpop.permute.xlu1 %1597  ;;  %v1430_v6 = vpop.permute.xlu0 %1429 }
 0xc6b   : > { %2890 = vmatpush3.xpose.msk.msra.mxu1 %vm343_vm2, %v1430_v6  ;;  %2900 = vmatpush3.xpose.msk.msra.mxu0 %vm343_vm2, %v1598_v5 }
 0xc6c   : > { %2909 = vmatprep.subr.mxu0 %v3234_v13  ;;  %2894 = vmatprep.subr.mxu1 %v3234_v13 }
 0xc6e   : > { %v1596_v7 = vpop.permute.xlu1 %1595  ;;  %2892 = vmatmul.mubr.msk.f32.vlgmr.msra.gmra.mrb[14].mxu1 %vm343_vm2, %v3568_v3  ;;  %v1770_v8 = vpop.permute.xlu0 %1769 }
 0xc6f   : > { %2902 = vmatmul.mubr.msk.f32.vlgmr.msra.gmra.mrb[12].mxu0 %vm343_vm2, %v1596_v7  ;;  %2896 = vmatprep.mubr.msk.f32.mxu1 %vm3233_vm1, %v3234_v13  ;;  %v1327_v7 = vld [vmem:[%s3822_s2 + $0xc0] sm:$0xff] }
 0xc70   : > { %2910 = vmatpush3.xpose.msk.msra.mxu0 %vm343_vm2, %v1770_v8  ;;  %2911 = vmatprep.mubr.msk.f32.mxu0 %vm3233_vm1, %v3234_v13  ;;  %v1328_v8 = vld [vmem:[%s3822_s2 + $0xc8] sm:$0xff] }
 0xc71   : > { %2919 = vmatprep.subr.mxu0 %v3234_v13 }
 0xc72   : > { %v1768_v9 = vpop.permute.xlu1 %1767  ;;  %v1942_v11 = vpop.permute.xlu0 %1941 }
 0xc73   : > { %2912 = vmatmul.mubr.msk.f32.vlgmr.msra.gmra.mrb[14].mxu0 %vm343_vm2, %v1768_v9 }
 0xc74   : > { %2920 = vmatpush3.xpose.msk.msra.mxu0 %vm343_vm2, %v1942_v11  ;;  %2921 = vmatprep.mubr.msk.f32.mxu0 %vm3233_vm1, %v3234_v13  ;;  %v3029_v11 = vpack.c.bf16 %v1328_v8, %v1327_v7 }
 0xc75   : > { %3028 = vmatprep.subr.bf16.mxu0 %v3232_v10 }
 0xc76   : > { %v1940_v12 = vpop.permute.xlu1 %1939 }
 0xc77   : > { %2922 = vmatmul.mubr.msk.f32.vlgmr.msra.gmra.mrb[16].mxu0 %vm343_vm2, %v1940_v12  ;;  %v1329_v12 = vld [vmem:[%s3822_s2 + $0xd0] sm:$0xff] }
 0xc78   : > { %2937 = vmatprep.mubr.msk.f32.mxu0 %vm3233_vm1, %v3234_v13  ;;  %3030 = vmatpush3.bf16.msra.mxu0 %v3029_v11 }
 0xc79   : > { %3031 = vmatprep.subr.bf16.mxu0 %v3232_v10 }
 0xd41   : > { %v1501_v14 = vpop.f32.mrb[14].mxu1 }
 0xd42   : > { %v1505_v15 = vmul.f32 0.35355338, %v1501_v14  ;;  %v2893_v16 = vpop.f32.mrb[15].mxu1  ;;  %v1669_v17 = vpop.f32.mrb[12].mxu0  ;;  %v1330_v14 = vld [vmem:[%s3822_s2 + $0xd8] sm:$0xff] }
 0xd43   : > { %v1673_v18 = vmul.f32 0.35355338, %v1669_v17  ;;  %v2903_v19 = vpop.f32.mrb[13].mxu0  ;;  %v3032_v16 = vpack.c.bf16 %v1330_v14, %v1329_v12 }
 0xd44   : > { %v1506_v20 = vadd.f32 %v3409_v35, %v1505_v15 }
 0xd45   : > { %v1674_v21 = vadd.f32 %v3409_v35, %v1673_v18  ;;  %3033 = vmatpush3.bf16.msra.mxu0 %v3032_v16  ;;  %v2687_v16 = vld [vmem:[%s3823_s3 + $0xf] ss:$0 sm:$0xff] }
 0xd46   : > { %v1841_v22 = vpop.f32.mrb[14].mxu0  ;;  %v1507_v24 = vsel %vm343_vm2, %v1506_v20, -inf  ;;  %3040 = vmatprep.subr.bf16.mxu0 %v3232_v10 }
 0xd47   : > { %v1845_v25 = vmul.f32 0.35355338, %v1841_v22  ;;  %1508 = vmax.xlane.f32.xlu0 %v1507_v24  ;;  %v2913_v26 = vpop.f32.mrb[15].mxu0  ;;  %v1675_v27 = vsel %vm343_vm2, %v1674_v21, -inf }
 0xd48   : > { %1676 = vmax.xlane.f32.xlu1 %v1675_v27 }
 0xd49   : > { %v1846_v28 = vadd.f32 %v3409_v35, %v1845_v25 }
 0xd4a   : > { %v2013_v29 = vpop.f32.mrb[16].mxu0 }
 0xd4b   : > { %v2017_v30 = vmul.f32 0.35355338, %v2013_v29  ;;  %v2923_v31 = vpop.f32.mrb[17].mxu0  ;;  %v1847_v32 = vsel %vm343_vm2, %v1846_v28, -inf }
 0xd4c   : > { %1848 = vmax.xlane.f32.xlu0 %v1847_v32 }
 0xd4d   : > { %v2018_v33 = vadd.f32 %v3409_v35, %v2017_v30 }
 0xd4f   : > { %v2019_v34 = vsel %vm343_vm2, %v2018_v33, -inf }
 0xd50   : > { %2020 = vmax.xlane.f32.xlu0 %v2019_v34 }
 0xd59   : > { %1518 = vrot.lane.b32.xlu1 %v3568_v3, %s3242_s27 }
 0xdd4   : > { %v1509_v36 = vpop.xlane.xlu0 %1508 }
 0xdd5   : > { %v1510_v37 = vsub.f32 %v1506_v20, %v1509_v36  ;;  %v1677_v38 = vpop.xlane.xlu1 %1676 }
 0xdd6   : > { %v1678_v39 = vsub.f32 %v1674_v21, %v1677_v38 }
 0xdd7   : > { %v1511_v40 = vmul.f32 1.442695, %v1510_v37 }
 0xdd8   : > { %v1679_v41 = vmul.f32 1.442695, %v1678_v39 }
 0xdd9   : > { %3144 = vpow2.f32 %v1511_v40  ;;  %v1519_v42 = vpop.permute.xlu1 %1518  ;;  %v1849_v43 = vpop.xlane.xlu0 %1848  ;;  %v1331_v40 = vld [vmem:[%s3822_s2 + $0xe0] sm:$0xff] }
 0xdda   : > { %3146 = vpow2.f32 %v1679_v41  ;;  %v1850_v44 = vsub.f32 %v1846_v28, %v1849_v43  ;;  %2895 = vmatpush3.msra.mxu1 %v1519_v42  ;;  %v2681_v28 = vld [vmem:[%s3823_s3 + $0xb] ss:$0 sm:$0xff]  ;;  %v1334_v43 = vld [vmem:[%s3822_s2 + $0xf8] sm:$0xff] }
 0xddb   : > { %2904 = vmatprep.subr.mxu1 %v3234_v13  ;;  %v1332_v41 = vld [vmem:[%s3822_s2 + $0xe8] sm:$0xff] }
 0xddc   : > { %v1851_v35 = vmul.f32 1.442695, %v1850_v44  ;;  %v3035_v42 = vpack.c.bf16 %v1332_v41, %v1331_v40  ;;  %v2690_v41 = vld [vmem:[%s3823_s3 + $0x11] ss:$0 sm:$0xff] }
 0xddd   : > { %v2021_v45 = vpop.xlane.xlu0 %2020 }
 0xdde   : > { %3148 = vpow2.f32 %v1851_v35  ;;  %v2022_v46 = vsub.f32 %v2018_v33, %v2021_v45 }
 0xde0   : > { %v2023_v47 = vmul.f32 1.442695, %v2022_v46 }
 0xde2   : > { %3150 = vpow2.f32 %v2023_v47 }
 0xde3   : > { %v3145_v48 = vpop.eup %3144 }
 0xde4   : > { %v3147_v49 = vpop.eup %3146  ;;  %v1513_v50 = vsel %vm343_vm2, %v3145_v48, 0.0 }
 0xde5   : > { %1514 = vadd.xlane.f32.xlu1 %v1513_v50  ;;  %v1681_v51 = vsel %vm343_vm2, %v3147_v49, 0.0  ;;  %v2684_v50 = vld [vmem:[%s3823_s3 + $0xd] ss:$0 sm:$0xff] }
 0xde6   : > { %1682 = vadd.xlane.f32.xlu0 %v1681_v51 }
 0xde8   : > { %v3149_v52 = vpop.eup %3148 }
 0xde9   : > { %v1853_v53 = vsel %vm343_vm2, %v3149_v52, 0.0 }
 0xdea   : > { %1854 = vadd.xlane.f32.xlu1 %v1853_v53  ;;  %v1335_v53 = vld [vmem:[%s3822_s2 + $0x100] sm:$0xff] }
 0xdec   : > { %v3151_v54 = vpop.eup %3150 }
 0xded   : > { %v2025_v55 = vsel %vm343_vm2, %v3151_v54, 0.0 }
 0xdee   : > { %2026 = vadd.xlane.f32.xlu0 %v2025_v55 }
 0xdfb   : > { %1858 = vrot.lane.b32.xlu1 %v3568_v3, %s3833_s30 }
 0xdff   : > { %2030 = vrot.lane.b32.xlu1 %v3568_v3, %s3834_s5 }
 0xe04   : > { %1686 = vrot.lane.b32.xlu0 %v3568_v3, %s3835_s6  ;;  %s197_s6 = sand.u32 1, %s3222_s16  }
 0xe05   : > { %s198_s10 = scalar_lea.vmem [#allocation3], %s197_s6 }
 0xe06   : > { %s2571_s27 = sshll.u32 %s198_s10, 4  ;;  %s3780_s27 = int_to_ptr.vmem [resolvable:$true] %s2571_s27 }
 0xe72   : > { %v1515_v56 = vpop.xlane.xlu1 %1514 }
 0xe73   : > { %3152 = vrcp.f32 %v1515_v56  ;;  %v1683_v57 = vpop.xlane.xlu0 %1682  ;;  %v1337_v56 = vld [vmem:[%s3822_s2 + $0x110] sm:$0xff] }
 0xe74   : > { %3154 = vrcp.f32 %v1683_v57  ;;  %v1338_v57 = vld [vmem:[%s3822_s2 + $0x118] sm:$0xff] }
 0xe77   : > { %v1855_v58 = vpop.xlane.xlu1 %1854 }
 0xe78   : > { %3156 = vrcp.f32 %v1855_v58  ;;  %v3044_v58 = vpack.c.bf16 %v1338_v57, %v1337_v56 }
 0xe7b   : > { %v2027_v59 = vpop.xlane.xlu0 %2026  ;;  %v1859_v1 = vpop.permute.xlu1 %1858 }
 0xe7c   : > { %3158 = vrcp.f32 %v2027_v59  ;;  %v1339_v59 = vld [vmem:[%s3822_s2 + $0x120] sm:$0xff] }
 0xe7d   : > { %v3153_v60 = vpop.eup %3152 }
 0xe7e   : > { %v1517_v61 = vmul.f32 %v3153_v60, %v3145_v48  ;;  %v3155_v62 = vpop.eup %3154  ;;  %v2683_v48 = vld [vmem:[%s3823_s3 + $0xc] ss:$0 sm:$0xff] }
 0xe7f   : > { %v1687_v63 = vpop.permute.xlu0 %1686  ;;  %v1685_v23 = vmul.f32 %v3155_v62, %v3147_v49  ;;  %v2031_v5 = vpop.permute.xlu1 %2030  ;;  %v1340_v60 = vld [vmem:[%s3822_s2 + $0x128] sm:$0xff]  ;;  %v1341_v62 = vld [vmem:[%s3822_s2 + $0x130] sm:$0xff] }
 0xe80   : > { %2897 = vmatmul.mubr.msk.f32.vlgmr.msra.gmra.mrb[16].mxu1 %vm343_vm2, %v1517_v61  ;;  %v3047_v61 = vpack.c.bf16 %v1340_v60, %v1339_v59 }
 0xe81   : > { %2905 = vmatpush3.msra.mxu1 %v1687_v63  ;;  %2906 = vmatprep.mubr.msk.f32.mxu1 %vm3233_vm1, %v3234_v13  ;;  %v1342_v63 = vld [vmem:[%s3822_s2 + $0x138] sm:$0xff] }
 0xe82   : > { %2914 = vmatprep.subr.mxu1 %v3234_v13  ;;  %v3157_v2 = vpop.eup %3156 }
 0xe83   : > { %v1857_v3 = vmul.f32 %v3157_v2, %v3149_v52 }
 0xe84   : > { %2907 = vmatmul.mubr.msk.f32.vlgmr.msra.gmra.mrb[18].mxu1 %vm343_vm2, %v1685_v23  ;;  %v3050_v23 = vpack.c.bf16 %v1342_v63, %v1341_v62 }
 0xe85   : > { %2915 = vmatpush3.msra.mxu1 %v1859_v1  ;;  %2916 = vmatprep.mubr.msk.f32.mxu1 %vm3233_vm1, %v3234_v13  ;;  %v2685_v1 = vld [vmem:[%s3823_s3 + $0xe] ss:$0 sm:$0xff] }
 0xe86   : > { %2924 = vmatprep.subr.mxu1 %v3234_v13  ;;  %v3159_v4 = vpop.eup %3158 }
 0xe87   : > { %v2029_v6 = vmul.f32 %v3159_v4, %v3151_v54  ;;  %v1336_v54 = vld [vmem:[%s3822_s2 + $0x108] sm:$0xff] }
 0xe88   : > { %2917 = vmatmul.mubr.msk.f32.vlgmr.msra.gmra.mrb[20].mxu1 %vm343_vm2, %v1857_v3  ;;  %v3041_v55 = vpack.c.bf16 %v1336_v54, %v1335_v53 }
 0xe89   : > { %2925 = vmatpush3.msra.mxu1 %v2031_v5  ;;  %2926 = vmatprep.mubr.msk.f32.mxu1 %vm3233_vm1, %v3234_v13 }
 0xe8a   : > { %3034 = vmatprep.subr.bf16.mxu1 %v3232_v10 }
 0xe8c   : > { %2927 = vmatmul.mubr.msk.f32.vlgmr.msra.gmra.mrb[22].mxu1 %vm343_vm2, %v2029_v6 }
 0xe8d   : > { %2948 = vmatprep.mubr.msk.f32.mxu1 %vm3233_vm1, %v3234_v13  ;;  %3036 = vmatpush3.bf16.msra.mxu1 %v3035_v42 }
 0xe8e   : > { %3037 = vmatprep.subr.bf16.mxu1 %v3232_v10 }
 0xf53   : > { %v1590_v9 = vpop.f32.mrb[16].mxu1 }
 0xf54   : > { %1594 = vst.msk [vmem:[#allocation2] sm:$0xff] %vm343_vm2, %v1590_v9  ;;  %v2898_v15 = vpop.f32.mrb[17].mxu1 }
 0xf57   : > { %v1758_v17 = vpop.f32.mrb[18].mxu1 }
 0xf58   : > { %1763 = vrot.lane.b32.xlu0 %v1758_v17, %s3836_s28  ;;  %v2908_v18 = vpop.f32.mrb[19].mxu1  ;;  %s2559_s28 = scalar_lea.sflag [#allocation4], %s197_s6 }
 0xf5b   : > { %v1930_v19 = vpop.f32.mrb[20].mxu1 }
 0xf5c   : > { %1935 = vrot.lane.b32.xlu1 %v1930_v19, %s3837_s22  ;;  %v2918_v20 = vpop.f32.mrb[21].mxu1  ;;  %s3168_s22 = scalar_lea.vmem %s3780_s27, 16 }
 0xf5d   : > { %p3169_p11 = scmp.ne.s32.totalorder %s3780_s27, %s3168_s22 }
 0xf5f   : > { %v2102_v21 = vpop.f32.mrb[22].mxu1  ;;  %p3170_p12 = pnand %p3169_p11, %p3313_p5 }
 0xf60   : > { %2107 = vrot.lane.b32.xlu0 %v2102_v21, %s3838_s29  ;;  %v2928_v22 = vpop.f32.mrb[23].mxu1  ;;  %s3172_s29 = sshll.u32 %s3249_s19, 4  ;;  %s3173_s29 = int_to_ptr.vmem [resolvable:$false] %s3172_s29 }
 0xf61   : > { %p3171_p13 = pneg %p3170_p12  ;;  %s3174_s11 = scalar_lea.vmem %s3173_s29, 32 }
 0xf62   : > { %p3175_p0 = scmp.lt.s32.totalorder %s3780_s27, %s3173_s29  ;;  %p3176_p1 = scmp.lt.s32.totalorder %s3174_s11, %s3168_s22 }
 0xf64   : > { %p3177_p2 = por %p3176_p1, %p3175_p0 }
 0xf66   : > { %p3178_p3 = pnand %p3177_p2, %p3171_p13 }
 0xfca   : > { %v1764_v24 = vpop.permute.xlu0 %1763 }
 0xfcb   : > { %1766 = vst.msk [vmem:[#allocation2] sm:$0xff] %vm685_vm3, %v1764_v24 }
 0xfce   : > { %v1936_v25 = vpop.permute.xlu1 %1935 }
 0xfcf   : > { %1938 = vst.msk [vmem:[#allocation2] sm:$0xff] %vm858_vm4, %v1936_v25 }
 0xfd2   : > { %v2108_v26 = vpop.permute.xlu0 %2107 }
 0xfd3   : > { %2110 = vst.msk [vmem:[#allocation2] sm:$0xff] %vm1031_vm5, %v2108_v26 }
 0xfda   : > { %v2111_v27 = vld [vmem:[#allocation2] sm:$0xff] }
 0xfdb   : > { %2938 = vmatmul.mubr.msk.f32.vlgmr.msra.gmra.mrb[18].mxu0 %vm210_vm0, %v2111_v27 }
 0xfdc   : > { %2967 = vmatprep.mubr.msk.f32.mxu0 %vm3233_vm1, %v3234_v13  ;;  %3042 = vmatpush3.bf16.msra.mxu0 %v3041_v55 }
 0xfdd   : > { %3043 = vmatprep.subr.bf16.mxu0 %v3232_v10 }
 0xfe0   : > { %3045 = vmatpush3.bf16.msra.mxu0 %v3044_v58 }
 0xfe1   : > { %3046 = vmatprep.subr.bf16.mxu0 %v3232_v10 }
 0xfe4   : > { %3048 = vmatpush3.bf16.msra.mxu0 %v3047_v61 }
 0xfe5   : > { %3049 = vmatprep.subr.bf16.mxu0 %v3232_v10 }
 0xfe8   : > { %3051 = vmatpush3.bf16.msra.mxu0 %v3050_v23 }
0x10ae   : > { %v2185_v29 = vpop.f32.mrb[18].mxu0 }
0x10af   : > { %v2186_v30 = vadd.f32 %v2681_v28, %v2185_v29  ;;  %v2939_v31 = vpop.f32.mrb[19].mxu0  ;;  %v2400_v28 = vld [vmem:[%s3822_s2 + $0x140] sm:$0xff]  ;;  %v2401_v29 = vld [vmem:[%s3822_s2 + $0x148] sm:$0xff] }
0x10b0   : > { %v2402_v31 = vld [vmem:[%s3822_s2 + $0x150] sm:$0xff] }
0x10b1   : > { %v2189_v32 = vadd.f32 %v2186_v30, %v3559_v0  ;;  %v1333_v0 = vld [vmem:[%s3822_s2 + $0xf0] sm:$0xff]  ;;  %v3053_v30 = vpack.c.bf16 %v2401_v29, %v2400_v28 }
0x10b2   : > { %v3038_v44 = vpack.c.bf16 %v1334_v43, %v1333_v0  ;;  %v2404_v43 = vld [vmem:[%s3822_s2 + $0x160] sm:$0xff] }
0x10b3   : > { %v2190_v33 = vsel %vm210_vm0, %v2189_v32, 0.0 }
0x10b4   : > { %2191 = vadd.xlane.f32.xlu1 %v2190_v33  ;;  %3039 = vmatpush3.bf16.msra.mxu1 %v3038_v44  ;;  %v2405_v44 = vld [vmem:[%s3822_s2 + $0x168] sm:$0xff] }
0x10b5   : > { %3052 = vmatprep.subr.bf16.mxu1 %v3232_v10 }
0x1141   : > { %v2192_v34 = vpop.xlane.xlu1 %2191 }
0x1142   : > { %v2193_v36 = vmul.f32 0.03125, %v2192_v34 }
0x1144   : > { %v2194_v37 = vsub.f32 %v2189_v32, %v2193_v36  ;;  %v2403_v32 = vld [vmem:[%s3822_s2 + $0x158] sm:$0xff] }
0x1145   : > { %v3056_v33 = vpack.c.bf16 %v2403_v32, %v2402_v31 }
0x1146   : > { %v2195_v38 = vmul.f32 %v2194_v37, %v2194_v37 }
0x1148   : > { %v2196_v39 = vsel %vm210_vm0, %v2195_v38, 0.0 }
0x1149   : > { %2197 = vadd.xlane.f32.xlu0 %v2196_v39  ;;  %v2689_v39 = vld [vmem:[%s3823_s3 + $0x10] ss:$0 sm:$0xff] }
0x11d6   : > { %v2198_v35 = vpop.xlane.xlu0 %2197 }
0x11d7   : > { %v2199_v45 = vmul.f32 0.03125, %v2198_v35  ;;  %v2406_v35 = vld [vmem:[%s3822_s2 + $0x170] sm:$0xff] }
0x11d9   : > { %v2200_v46 = vadd.f32 1e-12, %v2199_v45  ;;  %v3059_v45 = vpack.c.bf16 %v2405_v44, %v2404_v43 }
0x11db   : > { %3160 = vrsqrt.f32 %v2200_v46  ;;  %v2407_v46 = vld [vmem:[%s3822_s2 + $0x178] sm:$0xff] }
0x11e5   : > { %v3161_v47 = vpop.eup %3160 }
0x11e6   : > { %v2202_v49 = vmul.f32 %v3161_v47, %v2194_v37  ;;  %v2408_v47 = vld [vmem:[%s3823_s3 + $0x12] sm:$0x1] }
0x11e8   : > { %v2207_v51 = vmul.f32 %v2683_v48, %v2202_v49 }
0x11ea   : > { %v2212_v52 = vadd.f32 %v2684_v50, %v2207_v51 }
0x11ec   : > { %2949 = vmatmul.mubr.msk.f32.vlgmr.msra.gmra.mrb[24].mxu1 %vm210_vm0, %v2212_v52 }
0x11ed   : > { %2978 = vmatprep.mubr.msk.f32.mxu1 %vm3233_vm1, %v3234_v13  ;;  %3054 = vmatpush3.bf16.msra.mxu1 %v3053_v30 }
0x11ee   : > { %3055 = vmatprep.subr.bf16.mxu1 %v3232_v10 }
0x11f1   : > { %3057 = vmatpush3.bf16.msra.mxu1 %v3056_v33 }
0x11f2   : > { %3058 = vmatprep.subr.bf16.mxu1 %v3232_v10 }
0x12bf   : > { %v2286_v2 = vpop.f32.mrb[24].mxu1 }
0x12c0   : > { %v2287_v3 = vadd.f32 %v2685_v1, %v2286_v2  ;;  %v2950_v4 = vpop.f32.mrb[25].mxu1 }
0x12c2   : > { %v2291_v5 = vmul.f32 0.044715, %v2287_v3  ;;  %v2290_v12 = vmul.f32 0.5, %v2287_v3 }
0x12c4   : > { %v2292_v6 = vmul.f32 %v2291_v5, %v2287_v3 }
0x12c6   : > { %v2293_v7 = vmul.f32 %v2292_v6, %v2287_v3 }
0x12c8   : > { %v2294_v8 = vadd.f32 %v2293_v7, %v2287_v3 }
0x12ca   : > { %v2295_v9 = vmul.f32 0.7978846, %v2294_v8 }
0x12cc   : > { %3162 = vtanh.f32 %v2295_v9 }
0x12d6   : > { %v3163_v11 = vpop.eup %3162 }
0x12d7   : > { %v2297_v14 = vadd.f32 1.0, %v3163_v11 }
0x12d9   : > { %v2298_v15 = vmul.f32 %v2297_v14, %v2290_v12 }
0x12db   : > { %2968 = vmatmul.mubr.msk.f32.vlgmr.msra.gmra.mrb[20].mxu0 %vm1225_vm6, %v2298_v15 }
0x13ae   : > { %v2372_v17 = vpop.f32.mrb[20].mxu0 }
0x13af   : > { %v2373_v18 = vadd.f32 %v2687_v16, %v2372_v17  ;;  %v2969_v19 = vpop.f32.mrb[21].mxu0 }
0x13b1   : > { %v2376_v20 = vadd.f32 %v2373_v18, %v2212_v52  ;;  %v2409_v52 = vld [vmem:[%s3823_s3 + $0x13] sm:$0x1] }
0x13b3   : > { %v2377_v21 = vsel %vm210_vm0, %v2376_v20, 0.0 }
0x13b4   : > { %2378 = vadd.xlane.f32.xlu0 %v2377_v21 }
0x1441   : > { %v2379_v22 = vpop.xlane.xlu0 %2378 }
0x1442   : > { %v2380_v24 = vmul.f32 0.03125, %v2379_v22 }
0x1444   : > { %v2381_v25 = vsub.f32 %v2376_v20, %v2380_v24 }
0x1446   : > { %v2382_v26 = vmul.f32 %v2381_v25, %v2381_v25 }
0x1448   : > { %v2383_v27 = vsel %vm210_vm0, %v2382_v26, 0.0 }
0x1449   : > { %2384 = vadd.xlane.f32.xlu1 %v2383_v27 }
0x14d6   : > { %v2385_v34 = vpop.xlane.xlu1 %2384 }
0x14d7   : > { %v2386_v36 = vmul.f32 0.03125, %v2385_v34 }
0x14d9   : > { %v2387_v37 = vadd.f32 1e-12, %v2386_v36 }
0x14db   : > { %3164 = vrsqrt.f32 %v2387_v37 }
0x14e5   : > { %v3165_v38 = vpop.eup %3164 }
0x14e6   : > { %v2389_v40 = vmul.f32 %v3165_v38, %v2381_v25 }
0x14e8   : > { %v2394_v42 = vmul.f32 %v2689_v39, %v2389_v40 }
0x14ea   : > { %v2399_v0 = vadd.f32 %v2690_v41, %v2394_v42 }
0x14ec   : > { %2979 = vmatmul.mubr.msk.f32.vlgmr.msra.gmra.mrb[26].mxu1 %vm210_vm0, %v2399_v0 }
0x14ed   : > { %2989 = vmatprep.mubr.msk.f32.mxu1 %vm3233_vm1, %v3234_v13  ;;  %3060 = vmatpush3.bf16.msra.mxu1 %v3059_v45  ;;  %v3062_v13 = vpack.c.bf16 %v2407_v46, %v2406_v35 }
0x14ee   : > { %3061 = vmatprep.subr.bf16.mxu1 %v3232_v10 }
0x14f1   : > { %3063 = vmatpush3.bf16.msra.mxu1 %v3062_v13 }
0x15bf   : > { %v2479_v48 = vpop.f32.mrb[26].mxu1 }
0x15c0   : > { %v2480_v49 = vadd.f32 %v2479_v48, %v2408_v47  ;;  %v2980_v50 = vpop.f32.mrb[27].mxu1 }
0x15c2   : > { %3166 = vtanh.f32 %v2480_v49 }
0x15cc   : > { %v3167_v51 = vpop.eup %3166 }
0x15cd   : > { %2990 = vmatmul.mubr.msk.f32.vlgmr.msra.gmra.mrb[28].mxu1 %vm210_vm0, %v3167_v51 }
0x16a0   : > { %v2553_v10 = vpop.f32.mrb[28].mxu1 }
0x16a1   : > { %v2554_v53 = vadd.f32 %v2553_v10, %v2409_v52  ;;  %v2991_v54 = vpop.f32.mrb[29].mxu1 }
0x16a3   : > { %2557 = vst [vmem:[%s198_s10] sm:$0x1] %v2554_v53 }
0x16a4   : > { %3181 = shalt.err (!%p3178_p3)
}
0x16a5   : > { %s3182_s12 = scalar_lea.hbm %s3778_s23, 16  ;;  %s3186_s5 = scalar_lea.hbm %s3824_s4, 32 }
0x16a6   : > { %p3183_p4 = scmp.ne.s32.totalorder %s3778_s23, %s3182_s12  ;;  %p3187_p9 = scmp.lt.u32.totalorder %s3778_s23, %s3824_s4 }
0x16a7   : > { %p3188_p10 = scmp.lt.u32.totalorder %s3186_s5, %s3182_s12  ;;  %p3190_p12 = scmp.lt.u32.totalorder %s3182_s12, %s3778_s23 }
0x16a8   : > { %p3184_p7 = pnand %p3183_p4, %p3313_p5 }
0x16a9   : > { %p3189_p11 = por %p3188_p10, %p3187_p9 }
0x16aa   : > { %p3185_p8 = pneg %p3184_p7 }
0x16ab   : > { %p3191_p13 = por %p3190_p12, %p3189_p11 }
0x16ad   : > { %p3192_p0 = pnand %p3191_p13, %p3185_p8 }
0x16af   : > { %3195 = shalt.err (!%p3192_p0)
}
0x16b0   : > { %3064 = dma.vmem_to_hbm [thread:$0]  (%p3313_p5), %s3780_s27, 16, %s3778_s23, %s2559_s28  }
0x16b1 PF: > { %p3070_p1 = scmp.ge.s32.totalorder %s3230_s18, 2  ;;  %s2583_s8 = sand.u32 1, %s3218_s15  }
0x16b2   : > { %s2584_s9 = scalar_lea.sflag [#allocation4], %s2583_s8 }
0x16b3   : > { %p3067_p2 = pnand %p3070_p1, %p3317_p6 }
0x16b5   : > { %3213 = dma.done.wait (!%p3067_p2), %s2584_s9, 16  }
0x16b6   : > { %3215 = vsyncadd (!%p3067_p2), %s2584_s9, 4294967280  ;;  %p14_p3 = scmp.ge.s32.totalorder %s3300_s21, 4   ;;  %s3839_s15 = smov %s3222_s16 }
0x16b7   : > { %s3840_s16 = smov %s3226_s17  ;;  %s3841_s17 = smov %s3311_s24 }
0x16b8   : > { %s3842_s18 = smov %s3300_s21  ;;  %16 = sbr.rel (!%p14_p3) target bundleno = 3 (0x3), region = 74 }
0x16bf   :  { %2588 = vsyncpa [#allocation4], 1 }
0x16c0   :  { %2590 = vsyncpa [#allocation4 + $0x1], 1 }

</bundles_post_ra>
